<compile_context>
chip_gen: v6e
topology: v6e:2x2x1
jax: 0.10.0
libtpu: 0.0.40
codegen_flags: <defaults>
</compile_context>

<pallas_src>
import jax
import jax.numpy as jnp
from jax import lax
from jax.experimental import pallas as pl
from jax.experimental.pallas import tpu as pltpu


# ----------------------------------------------------------------------------
# helpers
# ----------------------------------------------------------------------------
def _leaky(x, slope):
    return jnp.where(x >= 0, x, slope * x)


def _round_up(a, b):
    return (a + b - 1) // b * b


def _zero_insert(x, stride):
    """PyTorch ConvTranspose1d input up-sampling: insert stride-1 zeros."""
    if stride == 1:
        return x
    B, C, L = x.shape
    z = jnp.zeros((B, C, L, stride - 1), x.dtype)
    xu = jnp.concatenate([x[..., None], z], axis=-1).reshape(B, C, L * stride)
    return xu[..., : (L - 1) * stride + 1]


def _pick_group(Lc, hop):
    """Smallest divisor g of Lc such that g*hop is 128-lane aligned (else 1)."""
    for gg in range(1, Lc + 1):
        if Lc % gg == 0 and (gg * hop) % 128 == 0:
            return gg
    return 1


def _compiler_params(dimension_semantics):
    kw = dict(dimension_semantics=dimension_semantics)
    try:
        cap = int(getattr(pltpu.get_tpu_info(), "vmem_capacity_bytes", 0))
        if cap >= (8 << 20):
            # explicit scoped-VMEM limit: 3/4 of physical, capped at 100 MiB
            kw["vmem_limit_bytes"] = int(min(cap * 3 // 4, 100 * (1 << 20)))
    except Exception:
        pass
    return pltpu.CompilerParams(**kw)


# ----------------------------------------------------------------------------
# Pallas kernel 1: fused KernelPredictor (single launch, batch folded into M).
#   layout inside: rows = (batch-stacked, zero-haloed) time, lanes = channels.
# ----------------------------------------------------------------------------
def _make_kp_kernel(*, B, Lc, S, HALO, K_in, Kp, slope):
    pad_in = (K_in - 1) // 2
    pad_res = (Kp - 1) // 2
    assert HALO >= max(pad_in, pad_res)

    def _tight_stack(src, pad, K):
        # im2col over per-batch interior rows; halos provide the zero padding.
        blocks = []
        for b in range(B):
            base = b * S + HALO - pad
            taps = [src[base + k: base + k + Lc, :] for k in range(K)]
            blocks.append(taps[0] if K == 1 else jnp.concatenate(taps, axis=1))
        return blocks[0] if B == 1 else jnp.concatenate(blocks, axis=0)

    def _conv(src, pad, K, W, bias):
        # (B*Lc, K*Cin) @ (K*Cin, Cout), default MXU precision, f32 accumulation.
        return jnp.dot(_tight_stack(src, pad, K), W,
                       preferred_element_type=jnp.float32) + bias

    def kernel(c_ref, win_ref, bin_ref, wr1_ref, br1_ref, wr2_ref, br2_ref,
               wk_ref, bk_ref, wb_ref, bb_ref, kf_ref, bf_ref, hbuf, rbuf):
        # persistent zero-haloed buffers (halos are written once, never touched)
        hbuf[...] = jnp.zeros_like(hbuf)
        rbuf[...] = jnp.zeros_like(rbuf)

        def write_rows(buf, val):
            for b in range(B):
                buf[b * S + HALO: b * S + HALO + Lc, :] = \
                    val[b * Lc:(b + 1) * Lc, :]

        # input conv + LeakyReLU
        h = _leaky(_conv(c_ref, pad_in, K_in, win_ref[...], bin_ref[...]), slope)
        write_rows(hbuf, h)
        # 3 residual blocks
        for j in range(wr1_ref.shape[0]):
            t = _leaky(_conv(hbuf, pad_res, Kp, wr1_ref[j], br1_ref[j]), slope)
            write_rows(rbuf, t)
            r = _leaky(_conv(rbuf, pad_res, Kp, wr2_ref[j], br2_ref[j]), slope)
            h = h + r
            write_rows(hbuf, h)

        kf = _conv(hbuf, pad_res, Kp, wk_ref[...], bk_ref[...])   # (B*Lc, ch_k)
        bf = _conv(hbuf, pad_res, Kp, wb_ref[...], bb_ref[...])   # (B*Lc, ch_b_pad)
        for b in range(B):
            kf_ref[b] = kf[b * Lc:(b + 1) * Lc, :]
            bf_ref[b] = bf[b * Lc:(b + 1) * Lc, :]

    return kernel


# ----------------------------------------------------------------------------
# Pallas kernel 2: fused convt_pre + nl LVC layers.
#   grid = (B, nl); the output block (index constant across the layer axis) is
#   the VMEM-resident accumulator for the running signal.
# ----------------------------------------------------------------------------
def _make_lvc_kernel(*, C, T, Kt, Kc, hop, Lc, dilations, pad0, g, slope):
    KC = Kc * C
    pad_lvc = (Kc - 1) // 2
    GW = g * hop                  # group width (multiple of 128 when achievable)
    NG = Lc // g
    assert NG * g == Lc

    def kernel(xu_ref, wt_ref, bt_ref, wc_ref, bc_ref, km_ref, bv_ref,
               o_ref, ypad_ref, stack_ref):
        layer = pl.program_id(1)

        # -- layer 0: init accumulator with convt_pre (ConvTranspose as im2col
        #    valid conv over the zero-inserted, pre-activated input).
        @pl.when(layer == 0)
        def _init():
            ypad_ref[...] = jnp.zeros_like(ypad_ref)      # halo stays 0 all layers
            xu = xu_ref[...]                              # (C, Tup)
            xstk = jnp.concatenate([xu[:, k:k + T] for k in range(Kt)], axis=0)
            o_ref[...] = (jnp.dot(wt_ref[...], xstk,
                                  preferred_element_type=jnp.float32)
                          + bt_ref[...])
            # TODO(synk): for very large strides, accumulate over taps instead of
            # the (Kt*C, T) im2col concat to bound the layer-0 temporary.

        # -- conv block: LeakyReLU -> dilated Conv1d (im2col matmul) -> LeakyReLU
        ypad_ref[:, pad0:pad0 + T] = _leaky(o_ref[...], slope)
        for idx, d in enumerate(dilations):               # static ladder, one runs
            pad_c = d * (Kc - 1) // 2

            @pl.when(layer == idx)
            def _build_stack(d=d, pad_c=pad_c):
                stack_ref[...] = jnp.concatenate(
                    [ypad_ref[:, pad0 + k * d - pad_c: pad0 + k * d - pad_c + T]
                     for k in range(Kc)], axis=0)

        y = _leaky(jnp.dot(wc_ref[...], stack_ref[...],
                           preferred_element_type=jnp.float32) + bc_ref[...],
                   slope)

        # -- location-variable convolution stack (dilation 1)
        ypad_ref[:, pad0:pad0 + T] = y
        stack_ref[...] = jnp.concatenate(
            [ypad_ref[:, pad0 - pad_lvc + k: pad0 - pad_lvc + k + T]
             for k in range(Kc)], axis=0)

        # -- per-segment matmuls with the sigmoid*tanh gate + residual fused in,
        #    grouped so each store is GW(=g*hop) lanes wide (128-aligned).
        def do_group(grp):
            static = isinstance(grp, int)
            if static:
                start = grp * GW
                chunk = stack_ref[:, start:start + GW]
                x_chunk = o_ref[:, start:start + GW]
            else:
                start = pl.multiple_of(grp * GW, GW)
                chunk = stack_ref[:, pl.ds(start, GW)]
                x_chunk = o_ref[:, pl.ds(start, GW)]
            outs = []
            for j in range(g):
                l = grp * g + j
                kmat = km_ref[l]                                  # (2C, Kc*C)
                bcol = bv_ref[:, l:l + 1] if static else bv_ref[:, pl.ds(l, 1)]
                seg = chunk[:, j * hop:(j + 1) * hop]             # (Kc*C, hop)
                outs.append(jnp.dot(kmat, seg,
                                    preferred_element_type=jnp.float32) + bcol)
            o_grp = outs[0] if g == 1 else jnp.concatenate(outs, axis=1)  # (2C, GW)
            upd = x_chunk + jax.nn.sigmoid(o_grp[:C]) * jnp.tanh(o_grp[C:])
            if static:
                o_ref[:, start:start + GW] = upd
            else:
                o_ref[:, pl.ds(start, GW)] = upd

        if NG <= 8:
            for grp in range(NG):        # fully unrolled, all indices static
                do_group(grp)
        else:
            def body(grp, carry):
                do_group(grp)
                return carry
            lax.fori_loop(0, NG, body, 0, unroll=4)

    return kernel


# ----------------------------------------------------------------------------
# parameters (deterministic synthetic init; same layout as PyTorch weights)
# ----------------------------------------------------------------------------
def init_params(key, C, cond_ch, stride, dilations, hid=16, kp_k=3, conv_k=3):
    keys = list(jax.random.split(key, 32))
    it = iter(keys)

    def w(shape, scale=0.1):
        return (scale * jax.random.normal(next(it), shape)).astype(jnp.float32)

    nl = len(dilations)
    Cout2 = 2 * C
    p = {}
    p["wt"] = w((C, C, 2 * stride))           # ConvTranspose1d weight (in, out, K)
    p["bt"] = w((C,))
    p["w_in"] = w((hid, cond_ch, 5))
    p["b_in"] = w((hid,))
    p["w_r1"] = [w((hid, hid, kp_k)) for _ in range(3)]
    p["b_r1"] = [w((hid,)) for _ in range(3)]
    p["w_r2"] = [w((hid, hid, kp_k)) for _ in range(3)]
    p["b_r2"] = [w((hid,)) for _ in range(3)]
    p["w_k"] = w((nl * C * Cout2 * conv_k, hid, kp_k))
    p["b_k"] = w((nl * C * Cout2 * conv_k,))
    p["w_b"] = w((nl * Cout2, hid, kp_k))
    p["b_b"] = w((nl * Cout2,))
    p["w_c"] = [w((C, C, conv_k)) for _ in range(nl)]
    p["b_c"] = [w((C,)) for _ in range(nl)]
    return p


# ----------------------------------------------------------------------------
# LVCBlock forward using the two fused Pallas kernels
# ----------------------------------------------------------------------------
def lvc_block_pallas(x, c, p, *, stride, dilations, hop, lrelu_slope=0.2):
    B, C, _ = x.shape
    cond_ch, Lc = c.shape[1], c.shape[2]
    nl = len(dilations)
    Cout2 = 2 * C
    Kc = p["w_c"][0].shape[2]
    Kp = p["w_k"].shape[2]
    K_in = p["w_in"].shape[2]
    hid = p["w_in"].shape[0]
    KC = Kc * C
    ch_k = p["w_k"].shape[0]                  # nl * C * 2C * Kc
    ch_b = p["w_b"].shape[0]                  # nl * 2C
    ch_b_pad = _round_up(ch_b, 128)           # lane-dense bias-head store
    T = Lc * hop

    # ---------------- KernelPredictor: one fused launch -----------------------
    HALO = 8                                  # sublane-aligned per-batch zero halo
    S = _round_up(Lc, 8) + 2 * HALO
    RB = B * S
    cT = c.transpose(0, 2, 1)                                     # (B, Lc, cond_ch)
    c_stacked = (jnp.zeros((B, S, cond_ch), jnp.float32)
                 .at[:, HALO:HALO + Lc, :].set(cT)
                 .reshape(RB, cond_ch))

    WinT = p["w_in"].transpose(2, 1, 0).reshape(K_in * cond_ch, hid)
    bin2 = p["b_in"].reshape(1, hid)
    Wr1T = jnp.stack([w.transpose(2, 1, 0).reshape(Kp * hid, hid) for w in p["w_r1"]])
    br1 = jnp.stack([b.reshape(1, hid) for b in p["b_r1"]])
    Wr2T = jnp.stack([w.transpose(2, 1, 0).reshape(Kp * hid, hid) for w in p["w_r2"]])
    br2 = jnp.stack([b.reshape(1, hid) for b in p["b_r2"]])

    # Fold the km repack permutation into the kernel-head weights (done once,
    # free) so kf reshapes straight into (B, Lc, nl, 2C, Kc*C) — no activation
    # transpose / extra HBM round-trip of the largest tensor.
    n_i, o_i, k_i, c_i = jnp.meshgrid(jnp.arange(nl), jnp.arange(Cout2),
                                      jnp.arange(Kc), jnp.arange(C), indexing="ij")
    perm = (((n_i * C + c_i) * Cout2 + o_i) * Kc + k_i).reshape(-1)
    WkT = p["w_k"].transpose(2, 1, 0).reshape(Kp * hid, ch_k)[:, perm]
    bk2 = p["b_k"][perm].reshape(1, ch_k)
    WbT = jnp.pad(p["w_b"].transpose(2, 1, 0).reshape(Kp * hid, ch_b),
                  ((0, 0), (0, ch_b_pad - ch_b)))
    bb2 = jnp.pad(p["b_b"], (0, ch_b_pad - ch_b)).reshape(1, ch_b_pad)

    kp_kernel = _make_kp_kernel(B=B, Lc=Lc, S=S, HALO=HALO, K_in=K_in, Kp=Kp,
                                slope=lrelu_slope)
    kf, bfp = pl.pallas_call(
        kp_kernel,
        out_shape=(jax.ShapeDtypeStruct((B, Lc, ch_k), jnp.float32),
                   jax.ShapeDtypeStruct((B, Lc, ch_b_pad), jnp.float32)),
        grid=(1,),
        in_specs=[
            pl.BlockSpec((RB, cond_ch), lambda i: (0, 0)),
            pl.BlockSpec((K_in * cond_ch, hid), lambda i: (0, 0)),
            pl.BlockSpec((1, hid), lambda i: (0, 0)),
            pl.BlockSpec((3, Kp * hid, hid), lambda i: (0, 0, 0)),
            pl.BlockSpec((3, 1, hid), lambda i: (0, 0, 0)),
            pl.BlockSpec((3, Kp * hid, hid), lambda i: (0, 0, 0)),
            pl.BlockSpec((3, 1, hid), lambda i: (0, 0, 0)),
            pl.BlockSpec((Kp * hid, ch_k), lambda i: (0, 0)),
            pl.BlockSpec((1, ch_k), lambda i: (0, 0)),
            pl.BlockSpec((Kp * hid, ch_b_pad), lambda i: (0, 0)),
            pl.BlockSpec((1, ch_b_pad), lambda i: (0, 0)),
        ],
        out_specs=(pl.BlockSpec((B, Lc, ch_k), lambda i: (0, 0, 0)),
                   pl.BlockSpec((B, Lc, ch_b_pad), lambda i: (0, 0, 0))),
        scratch_shapes=[pltpu.VMEM((RB, hid), jnp.float32),
                        pltpu.VMEM((RB, hid), jnp.float32)],
        compiler_params=_compiler_params(("arbitrary",)),
    )(c_stacked, WinT, bin2, Wr1T, br1, Wr2T, br2, WkT, bk2, WbT, bb2)
    # TODO(synk): at production channel counts, tile the ch_k output (N dim) of the
    # kernel head and add an Lc tile axis so per-step blocks fit v7x's 64 MiB VMEM.

    # Only reshapes / a tiny bias transpose remain wrapper-side.
    km_all = kf.reshape(B, Lc, nl, Cout2, KC)                      # (B, Lc, nl, 2C, Kc*C)
    bv_all = (bfp[..., :ch_b].reshape(B, Lc, nl, Cout2)
              .transpose(0, 2, 3, 1))                              # (B, nl, 2C, Lc) small

    # ---------------- convt_pre preprocessing (XLA) ---------------------------
    Kt = 2 * stride
    pad_t = stride // 2 + stride % 2
    op_t = stride % 2
    xa = _leaky(x, lrelu_slope)                 # LeakyReLU applied BEFORE upsampling
    xu = _zero_insert(xa, stride)
    xu = jnp.pad(xu, ((0, 0), (0, 0), (Kt - 1 - pad_t, Kt - 1 - pad_t + op_t)))
    Tup = xu.shape[2]
    assert Tup - (Kt - 1) == T, "upsampled length must equal cond_length * hop"
    w_eq = jnp.flip(p["wt"], axis=2).transpose(1, 0, 2)            # (Cout, Cin, Kt)
    Wt2 = w_eq.transpose(0, 2, 1).reshape(C, Kt * C)
    bt2 = p["bt"].reshape(C, 1)

    W2_all = jnp.stack([w.transpose(0, 2, 1).reshape(C, KC) for w in p["w_c"]])
    bc_all = jnp.stack([b.reshape(C, 1) for b in p["b_c"]])

    # halo: enough for the largest dilation, rounded to 128 for aligned stores
    pad_need = max([d * (Kc - 1) // 2 for d in dilations] + [(Kc - 1) // 2])
    pad0 = _round_up(pad_need, 128) if pad_need > 0 else 0
    assert pad0 >= pad_need, "ypad halo must cover the largest dilation"
    g = _pick_group(Lc, hop)                    # segments per step (128-aligned stores)
    assert Lc % g == 0

    lvc_kernel = _make_lvc_kernel(C=C, T=T, Kt=Kt, Kc=Kc, hop=hop, Lc=Lc,
                                  dilations=tuple(dilations), pad0=pad0, g=g,
                                  slope=lrelu_slope)
    # TODO(synk): production T needs a halo-tiled T grid axis (and, for B==1 on
    # v7x, a second parallel axis / core_map so both TensorCores are used); KC
    # can be zero-padded to a 128 multiple at production C for clean km tiling.
    out = pl.pallas_call(
        lvc_kernel,
        out_shape=jax.ShapeDtypeStruct((B, C, T), jnp.float32),
        grid=(B, nl),
        in_specs=[
            pl.BlockSpec((None, C, Tup), lambda b, i: (b, 0, 0)),          # xu
            pl.BlockSpec((C, Kt * C), lambda b, i: (0, 0)),                # Wt2
            pl.BlockSpec((C, 1), lambda b, i: (0, 0)),                     # bt
            pl.BlockSpec((None, C, KC), lambda b, i: (i, 0, 0)),           # conv W / layer
            pl.BlockSpec((None, C, 1), lambda b, i: (i, 0, 0)),            # conv b / layer
            pl.BlockSpec((None, Lc, None, Cout2, KC),
                         lambda b, i: (b, 0, i, 0, 0)),                    # km / (b, layer)
            pl.BlockSpec((None, None, Cout2, Lc),
                         lambda b, i: (b, i, 0, 0)),                       # bv / (b, layer)
        ],
        out_specs=pl.BlockSpec((None, C, T), lambda b, i: (b, 0, 0)),      # resident acc
        scratch_shapes=[
            pltpu.VMEM((C, T + 2 * pad0), jnp.float32),   # zero-haloed activations
            pltpu.VMEM((KC, T), jnp.float32),             # im2col stack
        ],
        compiler_params=_compiler_params(("parallel", "arbitrary")),
    )(xu, Wt2, bt2, W2_all, bc_all, km_all, bv_all)
    return out


# ----------------------------------------------------------------------------
# pure-JAX reference (follows the PyTorch code) for a correctness check
# ----------------------------------------------------------------------------
def _ref_conv1d(x, w, b, dilation=1, padding=0):
    out = lax.conv_general_dilated(
        x, w, window_strides=(1,), padding=[(padding, padding)],
        rhs_dilation=(dilation,), dimension_numbers=("NCH", "OIH", "NCH"),
        precision=lax.Precision.HIGHEST)
    return out + b[None, :, None]


def _ref_conv_transpose1d(x, w, b, stride, padding, output_padding):
    K = w.shape[2]
    w2 = jnp.flip(w, axis=2).transpose(1, 0, 2)
    out = lax.conv_general_dilated(
        x, w2, window_strides=(1,),
        padding=[(K - 1 - padding, K - 1 - padding + output_padding)],
        lhs_dilation=(stride,), dimension_numbers=("NCH", "OIH", "NCH"),
        precision=lax.Precision.HIGHEST)
    return out + b[None, :, None]


def _ref_lvc(x, kernel, bias, hop):
    B, Cin, T = x.shape
    _, _, Cout, K, L = kernel.shape
    pad = (K - 1) // 2
    xpd = jnp.pad(x, ((0, 0), (0, 0), (pad, pad)))
    idx = jnp.arange(L)[:, None] * hop + jnp.arange(hop + 2 * pad)[None, :]
    xu = xpd[:, :, idx]
    idx2 = jnp.arange(hop)[:, None] + jnp.arange(K)[None, :]
    xw = xu[:, :, :, idx2]
    o = jnp.einsum("bilsk,biokl->bols", xw, kernel, precision=lax.Precision.HIGHEST)
    o = o + bias[:, :, :, None]
    return o.reshape(B, Cout, L * hop)


def lvc_block_ref(x, c, p, *, stride, dilations, hop, lrelu_slope=0.2):
    B, C, _ = x.shape
    Lc = c.shape[2]
    nl = len(dilations)
    Cout2 = 2 * C
    Kc = p["w_c"][0].shape[2]
    pad_t = stride // 2 + stride % 2
    op_t = stride % 2
    xr = _ref_conv_transpose1d(_leaky(x, lrelu_slope), p["wt"], p["bt"],
                               stride, pad_t, op_t)
    h = _leaky(_ref_conv1d(c, p["w_in"], p["b_in"], padding=2), lrelu_slope)
    for j in range(3):
        r = _leaky(_ref_conv1d(h, p["w_r1"][j], p["b_r1"][j], padding=1), lrelu_slope)
        r = _leaky(_ref_conv1d(r, p["w_r2"][j], p["b_r2"][j], padding=1), lrelu_slope)
        h = h + r
    kf = _ref_conv1d(h, p["w_k"], p["b_k"], padding=1)
    bf = _ref_conv1d(h, p["w_b"], p["b_b"], padding=1)
    kernels = kf.reshape(B, nl, C, Cout2, Kc, Lc)
    biases = bf.reshape(B, nl, Cout2, Lc)
    for i, d in enumerate(dilations):
        y = _leaky(xr, lrelu_slope)
        y = _leaky(_ref_conv1d(y, p["w_c"][i], p["b_c"][i], dilation=d, padding=d),
                   lrelu_slope)
        o = _ref_lvc(y, kernels[:, i], biases[:, i], hop)
        xr = xr + jax.nn.sigmoid(o[:, :C]) * jnp.tanh(o[:, C:])
    return xr


# ----------------------------------------------------------------------------
if __name__ == "__main__":
    B = 2
    in_channels = 4
    cond_channels = 4
    stride = 2
    dilations = [1, 3, 9, 27]
    hop = 32                     # cond_hop_length (kept small for the demo)
    kpnet_hidden = 16
    cond_length = 4
    in_length = cond_length * hop // stride      # 64 -> upsampled to 128 = cond_length*hop

    key = jax.random.PRNGKey(0)
    kx, kc, kp = jax.random.split(key, 3)
    x = jax.random.normal(kx, (B, in_channels, in_length), jnp.float32)
    c = jax.random.normal(kc, (B, cond_channels, cond_length), jnp.float32)
    params = init_params(kp, in_channels, cond_channels, stride, dilations,
                         hid=kpnet_hidden)

    out = lvc_block_pallas(x, c, params, stride=stride, dilations=dilations, hop=hop)
    out = jax.block_until_ready(out)

    ref = lvc_block_ref(x, c, params, stride=stride, dilations=dilations, hop=hop)
    if out.shape != (B, in_channels, cond_length * hop):
        raise AssertionError(f"bad output shape {out.shape}")
    # tolerance loosened: in-kernel matmuls now run at default (bf16-class) MXU
    # precision with f32 accumulation, reference is full f32 (HIGHEST).
    if not bool(jnp.allclose(out, ref, atol=5e-2, rtol=5e-2)):
        err = float(jnp.max(jnp.abs(out - ref)))
        raise AssertionError(f"Pallas/ref mismatch, max abs err = {err}")
    print("KERNEL_OK")
</pallas_src>

<mosaic_0001>
module attributes {stable_mosaic.version = 11 : i64} {
  func.func @kernel(%arg0: i32, %arg1: memref<48x4xf32, #tpu.memory_space<vmem>>, %arg2: memref<20x16xf32, #tpu.memory_space<vmem>>, %arg3: memref<1x16xf32, #tpu.memory_space<vmem>>, %arg4: memref<3x48x16xf32, #tpu.memory_space<vmem>>, %arg5: memref<3x1x16xf32, #tpu.memory_space<vmem>>, %arg6: memref<3x48x16xf32, #tpu.memory_space<vmem>>, %arg7: memref<3x1x16xf32, #tpu.memory_space<vmem>>, %arg8: memref<48x384xf32, #tpu.memory_space<vmem>>, %arg9: memref<1x384xf32, #tpu.memory_space<vmem>>, %arg10: memref<48x128xf32, #tpu.memory_space<vmem>>, %arg11: memref<1x128xf32, #tpu.memory_space<vmem>>, %arg12: memref<2x4x384xf32, #tpu.memory_space<vmem>>, %arg13: memref<2x4x128xf32, #tpu.memory_space<vmem>>, %arg14: memref<48x16xf32, #tpu.memory_space<vmem>>, %arg15: memref<48x16xf32, #tpu.memory_space<vmem>>) attributes {dimension_semantics = [#tpu.dimension_semantics<arbitrary>], iteration_bounds = array<i64: 1>, scalar_prefetch = 0 : i64, scratch_operands = 2 : i64, tpu.core_type = #tpu.core_type<tc>, window_params = [{pipeline_mode = #tpu.pipeline_mode<synchronous>, transform_indices = @transform_0, window_bounds = array<i64: 48, 4>}, {pipeline_mode = #tpu.pipeline_mode<synchronous>, transform_indices = @transform_1, window_bounds = array<i64: 20, 16>}, {pipeline_mode = #tpu.pipeline_mode<synchronous>, transform_indices = @transform_2, window_bounds = array<i64: 1, 16>}, {pipeline_mode = #tpu.pipeline_mode<synchronous>, transform_indices = @transform_3, window_bounds = array<i64: 3, 48, 16>}, {pipeline_mode = #tpu.pipeline_mode<synchronous>, transform_indices = @transform_4, window_bounds = array<i64: 3, 1, 16>}, {pipeline_mode = #tpu.pipeline_mode<synchronous>, transform_indices = @transform_5, window_bounds = array<i64: 3, 48, 16>}, {pipeline_mode = #tpu.pipeline_mode<synchronous>, transform_indices = @transform_6, window_bounds = array<i64: 3, 1, 16>}, {pipeline_mode = #tpu.pipeline_mode<synchronous>, transform_indices = @transform_7, window_bounds = array<i64: 48, 384>}, {pipeline_mode = #tpu.pipeline_mode<synchronous>, transform_indices = @transform_8, window_bounds = array<i64: 1, 384>}, {pipeline_mode = #tpu.pipeline_mode<synchronous>, transform_indices = @transform_9, window_bounds = array<i64: 48, 128>}, {pipeline_mode = #tpu.pipeline_mode<synchronous>, transform_indices = @transform_10, window_bounds = array<i64: 1, 128>}, {pipeline_mode = #tpu.pipeline_mode<synchronous>, transform_indices = @transform_11, window_bounds = array<i64: 2, 4, 384>}, {pipeline_mode = #tpu.pipeline_mode<synchronous>, transform_indices = @transform_12, window_bounds = array<i64: 2, 4, 128>}]} {
    %cst = arith.constant 0.000000e+00 : f32
    %0 = vector.broadcast %cst : f32 to vector<48x16xf32>
    %c0 = arith.constant 0 : index
    %c0_0 = arith.constant 0 : index
    %1 = vector.load %arg14[%c0, %c0_0] : memref<48x16xf32, #tpu.memory_space<vmem>>, vector<48x16xf32>
    tpu.vector_store %arg14[%c0, %c0_0], %0 {strides = array<i32>} : memref<48x16xf32, #tpu.memory_space<vmem>>, vector<48x16xf32>,
    %cst_1 = arith.constant 0.000000e+00 : f32
    %2 = vector.broadcast %cst_1 : f32 to vector<48x16xf32>
    %c0_2 = arith.constant 0 : index
    %c0_3 = arith.constant 0 : index
    %3 = vector.load %arg15[%c0_2, %c0_3] : memref<48x16xf32, #tpu.memory_space<vmem>>, vector<48x16xf32>
    tpu.vector_store %arg15[%c0_2, %c0_3], %2 {strides = array<i32>} : memref<48x16xf32, #tpu.memory_space<vmem>>, vector<48x16xf32>,
    %c0_4 = arith.constant 0 : index
    %c0_5 = arith.constant 0 : index
    %4 = vector.load %arg2[%c0_4, %c0_5] : memref<20x16xf32, #tpu.memory_space<vmem>>, vector<20x16xf32>
    %c0_6 = arith.constant 0 : index
    %c0_7 = arith.constant 0 : index
    %5 = vector.load %arg3[%c0_6, %c0_7] : memref<1x16xf32, #tpu.memory_space<vmem>>, vector<1x16xf32>
    %c6 = arith.constant 6 : index
    %c0_8 = arith.constant 0 : index
    %6 = vector.load %arg1[%c6, %c0_8] : memref<48x4xf32, #tpu.memory_space<vmem>>, vector<4x4xf32>
    %c7 = arith.constant 7 : index
    %c0_9 = arith.constant 0 : index
    %7 = vector.load %arg1[%c7, %c0_9] : memref<48x4xf32, #tpu.memory_space<vmem>>, vector<4x4xf32>
    %c8 = arith.constant 8 : index
    %c0_10 = arith.constant 0 : index
    %8 = vector.load %arg1[%c8, %c0_10] : memref<48x4xf32, #tpu.memory_space<vmem>>, vector<4x4xf32>
    %c9 = arith.constant 9 : index
    %c0_11 = arith.constant 0 : index
    %9 = vector.load %arg1[%c9, %c0_11] : memref<48x4xf32, #tpu.memory_space<vmem>>, vector<4x4xf32>
    %c10 = arith.constant 10 : index
    %c0_12 = arith.constant 0 : index
    %10 = vector.load %arg1[%c10, %c0_12] : memref<48x4xf32, #tpu.memory_space<vmem>>, vector<4x4xf32>
    %11 = tpu.concatenate %6, %7, %8, %9, %10 in 1 : vector<4x4xf32>, vector<4x4xf32>, vector<4x4xf32>, vector<4x4xf32>, vector<4x4xf32> -> vector<4x20xf32>
    %c30 = arith.constant 30 : index
    %c0_13 = arith.constant 0 : index
    %12 = vector.load %arg1[%c30, %c0_13] : memref<48x4xf32, #tpu.memory_space<vmem>>, vector<4x4xf32>
    %c31 = arith.constant 31 : index
    %c0_14 = arith.constant 0 : index
    %13 = vector.load %arg1[%c31, %c0_14] : memref<48x4xf32, #tpu.memory_space<vmem>>, vector<4x4xf32>
    %c32 = arith.constant 32 : index
    %c0_15 = arith.constant 0 : index
    %14 = vector.load %arg1[%c32, %c0_15] : memref<48x4xf32, #tpu.memory_space<vmem>>, vector<4x4xf32>
    %c33 = arith.constant 33 : index
    %c0_16 = arith.constant 0 : index
    %15 = vector.load %arg1[%c33, %c0_16] : memref<48x4xf32, #tpu.memory_space<vmem>>, vector<4x4xf32>
    %c34 = arith.constant 34 : index
    %c0_17 = arith.constant 0 : index
    %16 = vector.load %arg1[%c34, %c0_17] : memref<48x4xf32, #tpu.memory_space<vmem>>, vector<4x4xf32>
    %17 = tpu.concatenate %12, %13, %14, %15, %16 in 1 : vector<4x4xf32>, vector<4x4xf32>, vector<4x4xf32>, vector<4x4xf32>, vector<4x4xf32> -> vector<4x20xf32>
    %18 = tpu.concatenate %11, %17 in 0 : vector<4x20xf32>, vector<4x20xf32> -> vector<8x20xf32>
    %cst_18 = arith.constant dense<0.000000e+00> : vector<8x16xf32>
    %19 = tpu.matmul %18, %4, %cst_18 {dimension_numbers = #tpu.dot_dimension_numbers<[1], [0], [0], [1], [0, 0, 1, 1], [], []>} : vector<8x20xf32>, vector<20x16xf32>, vector<8x16xf32> -> vector<8x16xf32>
    %20 = vector.broadcast %5 : vector<1x16xf32> to vector<8x16xf32>
    %21 = arith.addf %19, %20 : vector<8x16xf32>
    %cst_19 = arith.constant 0.000000e+00 : f32
    %22 = vector.broadcast %cst_19 : f32 to vector<8x16xf32>
    %23 = arith.cmpf oge, %21, %22 : vector<8x16xf32>
    %cst_20 = arith.constant 2.000000e-01 : f32
    %24 = vector.broadcast %cst_20 : f32 to vector<8x16xf32>
    %25 = arith.mulf %24, %21 : vector<8x16xf32>
    %26 = arith.select %23, %21, %25 : vector<8x16xi1>, vector<8x16xf32>
    %27 = vector.extract_strided_slice %26 {offsets = [0, 0], sizes = [4, 16], strides = [1, 1]} : vector<8x16xf32> to vector<4x16xf32>
    %c8_21 = arith.constant 8 : index
    %c0_22 = arith.constant 0 : index
    %28 = vector.load %arg14[%c8_21, %c0_22] : memref<48x16xf32, #tpu.memory_space<vmem>>, vector<4x16xf32>
    tpu.vector_store %arg14[%c8_21, %c0_22], %27 {strides = array<i32>} : memref<48x16xf32, #tpu.memory_space<vmem>>, vector<4x16xf32>,
    %29 = vector.extract_strided_slice %26 {offsets = [4, 0], sizes = [4, 16], strides = [1, 1]} : vector<8x16xf32> to vector<4x16xf32>
    %c32_23 = arith.constant 32 : index
    %c0_24 = arith.constant 0 : index
    %30 = vector.load %arg14[%c32_23, %c0_24] : memref<48x16xf32, #tpu.memory_space<vmem>>, vector<4x16xf32>
    tpu.vector_store %arg14[%c32_23, %c0_24], %29 {strides = array<i32>} : memref<48x16xf32, #tpu.memory_space<vmem>>, vector<4x16xf32>,
    %c0_25 = arith.constant 0 : index
    %c0_26 = arith.constant 0 : index
    %c0_27 = arith.constant 0 : index
    %31 = vector.load %arg4[%c0_25, %c0_26, %c0_27] : memref<3x48x16xf32, #tpu.memory_space<vmem>>, vector<1x48x16xf32>
    %32 = vector.shape_cast %31 : vector<1x48x16xf32> to vector<48x16xf32>
    %c0_28 = arith.constant 0 : index
    %c0_29 = arith.constant 0 : index
    %c0_30 = arith.constant 0 : index
    %33 = vector.load %arg5[%c0_28, %c0_29, %c0_30] : memref<3x1x16xf32, #tpu.memory_space<vmem>>, vector<1x1x16xf32>
    %34 = vector.shape_cast %33 : vector<1x1x16xf32> to vector<1x16xf32>
    %c7_31 = arith.constant 7 : index
    %c0_32 = arith.constant 0 : index
    %35 = vector.load %arg14[%c7_31, %c0_32] : memref<48x16xf32, #tpu.memory_space<vmem>>, vector<4x16xf32>
    %c8_33 = arith.constant 8 : index
    %c0_34 = arith.constant 0 : index
    %36 = vector.load %arg14[%c8_33, %c0_34] : memref<48x16xf32, #tpu.memory_space<vmem>>, vector<4x16xf32>
    %c9_35 = arith.constant 9 : index
    %c0_36 = arith.constant 0 : index
    %37 = vector.load %arg14[%c9_35, %c0_36] : memref<48x16xf32, #tpu.memory_space<vmem>>, vector<4x16xf32>
    %38 = tpu.concatenate %35, %36, %37 in 1 : vector<4x16xf32>, vector<4x16xf32>, vector<4x16xf32> -> vector<4x48xf32>
    %c31_37 = arith.constant 31 : index
    %c0_38 = arith.constant 0 : index
    %39 = vector.load %arg14[%c31_37, %c0_38] : memref<48x16xf32, #tpu.memory_space<vmem>>, vector<4x16xf32>
    %c32_39 = arith.constant 32 : index
    %c0_40 = arith.constant 0 : index
    %40 = vector.load %arg14[%c32_39, %c0_40] : memref<48x16xf32, #tpu.memory_space<vmem>>, vector<4x16xf32>
    %c33_41 = arith.constant 33 : index
    %c0_42 = arith.constant 0 : index
    %41 = vector.load %arg14[%c33_41, %c0_42] : memref<48x16xf32, #tpu.memory_space<vmem>>, vector<4x16xf32>
    %42 = tpu.concatenate %39, %40, %41 in 1 : vector<4x16xf32>, vector<4x16xf32>, vector<4x16xf32> -> vector<4x48xf32>
    %43 = tpu.concatenate %38, %42 in 0 : vector<4x48xf32>, vector<4x48xf32> -> vector<8x48xf32>
    %cst_43 = arith.constant dense<0.000000e+00> : vector<8x16xf32>
    %44 = tpu.matmul %43, %32, %cst_43 {dimension_numbers = #tpu.dot_dimension_numbers<[1], [0], [0], [1], [0, 0, 1, 1], [], []>} : vector<8x48xf32>, vector<48x16xf32>, vector<8x16xf32> -> vector<8x16xf32>
    %45 = vector.broadcast %34 : vector<1x16xf32> to vector<8x16xf32>
    %46 = arith.addf %44, %45 : vector<8x16xf32>
    %cst_44 = arith.constant 0.000000e+00 : f32
    %47 = vector.broadcast %cst_44 : f32 to vector<8x16xf32>
    %48 = arith.cmpf oge, %46, %47 : vector<8x16xf32>
    %cst_45 = arith.constant 2.000000e-01 : f32
    %49 = vector.broadcast %cst_45 : f32 to vector<8x16xf32>
    %50 = arith.mulf %49, %46 : vector<8x16xf32>
    %51 = arith.select %48, %46, %50 : vector<8x16xi1>, vector<8x16xf32>
    %52 = vector.extract_strided_slice %51 {offsets = [0, 0], sizes = [4, 16], strides = [1, 1]} : vector<8x16xf32> to vector<4x16xf32>
    %c8_46 = arith.constant 8 : index
    %c0_47 = arith.constant 0 : index
    %53 = vector.load %arg15[%c8_46, %c0_47] : memref<48x16xf32, #tpu.memory_space<vmem>>, vector<4x16xf32>
    tpu.vector_store %arg15[%c8_46, %c0_47], %52 {strides = array<i32>} : memref<48x16xf32, #tpu.memory_space<vmem>>, vector<4x16xf32>,
    %54 = vector.extract_strided_slice %51 {offsets = [4, 0], sizes = [4, 16], strides = [1, 1]} : vector<8x16xf32> to vector<4x16xf32>
    %c32_48 = arith.constant 32 : index
    %c0_49 = arith.constant 0 : index
    %55 = vector.load %arg15[%c32_48, %c0_49] : memref<48x16xf32, #tpu.memory_space<vmem>>, vector<4x16xf32>
    tpu.vector_store %arg15[%c32_48, %c0_49], %54 {strides = array<i32>} : memref<48x16xf32, #tpu.memory_space<vmem>>, vector<4x16xf32>,
    %c0_50 = arith.constant 0 : index
    %c0_51 = arith.constant 0 : index
    %c0_52 = arith.constant 0 : index
    %56 = vector.load %arg6[%c0_50, %c0_51, %c0_52] : memref<3x48x16xf32, #tpu.memory_space<vmem>>, vector<1x48x16xf32>
    %57 = vector.shape_cast %56 : vector<1x48x16xf32> to vector<48x16xf32>
    %c0_53 = arith.constant 0 : index
    %c0_54 = arith.constant 0 : index
    %c0_55 = arith.constant 0 : index
    %58 = vector.load %arg7[%c0_53, %c0_54, %c0_55] : memref<3x1x16xf32, #tpu.memory_space<vmem>>, vector<1x1x16xf32>
    %59 = vector.shape_cast %58 : vector<1x1x16xf32> to vector<1x16xf32>
    %c7_56 = arith.constant 7 : index
    %c0_57 = arith.constant 0 : index
    %60 = vector.load %arg15[%c7_56, %c0_57] : memref<48x16xf32, #tpu.memory_space<vmem>>, vector<4x16xf32>
    %c8_58 = arith.constant 8 : index
    %c0_59 = arith.constant 0 : index
    %61 = vector.load %arg15[%c8_58, %c0_59] : memref<48x16xf32, #tpu.memory_space<vmem>>, vector<4x16xf32>
    %c9_60 = arith.constant 9 : index
    %c0_61 = arith.constant 0 : index
    %62 = vector.load %arg15[%c9_60, %c0_61] : memref<48x16xf32, #tpu.memory_space<vmem>>, vector<4x16xf32>
    %63 = tpu.concatenate %60, %61, %62 in 1 : vector<4x16xf32>, vector<4x16xf32>, vector<4x16xf32> -> vector<4x48xf32>
    %c31_62 = arith.constant 31 : index
    %c0_63 = arith.constant 0 : index
    %64 = vector.load %arg15[%c31_62, %c0_63] : memref<48x16xf32, #tpu.memory_space<vmem>>, vector<4x16xf32>
    %c32_64 = arith.constant 32 : index
    %c0_65 = arith.constant 0 : index
    %65 = vector.load %arg15[%c32_64, %c0_65] : memref<48x16xf32, #tpu.memory_space<vmem>>, vector<4x16xf32>
    %c33_66 = arith.constant 33 : index
    %c0_67 = arith.constant 0 : index
    %66 = vector.load %arg15[%c33_66, %c0_67] : memref<48x16xf32, #tpu.memory_space<vmem>>, vector<4x16xf32>
    %67 = tpu.concatenate %64, %65, %66 in 1 : vector<4x16xf32>, vector<4x16xf32>, vector<4x16xf32> -> vector<4x48xf32>
    %68 = tpu.concatenate %63, %67 in 0 : vector<4x48xf32>, vector<4x48xf32> -> vector<8x48xf32>
    %cst_68 = arith.constant dense<0.000000e+00> : vector<8x16xf32>
    %69 = tpu.matmul %68, %57, %cst_68 {dimension_numbers = #tpu.dot_dimension_numbers<[1], [0], [0], [1], [0, 0, 1, 1], [], []>} : vector<8x48xf32>, vector<48x16xf32>, vector<8x16xf32> -> vector<8x16xf32>
    %70 = vector.broadcast %59 : vector<1x16xf32> to vector<8x16xf32>
    %71 = arith.addf %69, %70 : vector<8x16xf32>
    %cst_69 = arith.constant 0.000000e+00 : f32
    %72 = vector.broadcast %cst_69 : f32 to vector<8x16xf32>
    %73 = arith.cmpf oge, %71, %72 : vector<8x16xf32>
    %cst_70 = arith.constant 2.000000e-01 : f32
    %74 = vector.broadcast %cst_70 : f32 to vector<8x16xf32>
    %75 = arith.mulf %74, %71 : vector<8x16xf32>
    %76 = arith.select %73, %71, %75 : vector<8x16xi1>, vector<8x16xf32>
    %77 = arith.addf %26, %76 : vector<8x16xf32>
    %78 = vector.extract_strided_slice %77 {offsets = [0, 0], sizes = [4, 16], strides = [1, 1]} : vector<8x16xf32> to vector<4x16xf32>
    %c8_71 = arith.constant 8 : index
    %c0_72 = arith.constant 0 : index
    %79 = vector.load %arg14[%c8_71, %c0_72] : memref<48x16xf32, #tpu.memory_space<vmem>>, vector<4x16xf32>
    tpu.vector_store %arg14[%c8_71, %c0_72], %78 {strides = array<i32>} : memref<48x16xf32, #tpu.memory_space<vmem>>, vector<4x16xf32>,
    %80 = vector.extract_strided_slice %77 {offsets = [4, 0], sizes = [4, 16], strides = [1, 1]} : vector<8x16xf32> to vector<4x16xf32>
    %c32_73 = arith.constant 32 : index
    %c0_74 = arith.constant 0 : index
    %81 = vector.load %arg14[%c32_73, %c0_74] : memref<48x16xf32, #tpu.memory_space<vmem>>, vector<4x16xf32>
    tpu.vector_store %arg14[%c32_73, %c0_74], %80 {strides = array<i32>} : memref<48x16xf32, #tpu.memory_space<vmem>>, vector<4x16xf32>,
    %c1 = arith.constant 1 : index
    %c0_75 = arith.constant 0 : index
    %c0_76 = arith.constant 0 : index
    %82 = vector.load %arg4[%c1, %c0_75, %c0_76] : memref<3x48x16xf32, #tpu.memory_space<vmem>>, vector<1x48x16xf32>
    %83 = vector.shape_cast %82 : vector<1x48x16xf32> to vector<48x16xf32>
    %c1_77 = arith.constant 1 : index
    %c0_78 = arith.constant 0 : index
    %c0_79 = arith.constant 0 : index
    %84 = vector.load %arg5[%c1_77, %c0_78, %c0_79] : memref<3x1x16xf32, #tpu.memory_space<vmem>>, vector<1x1x16xf32>
    %85 = vector.shape_cast %84 : vector<1x1x16xf32> to vector<1x16xf32>
    %c7_80 = arith.constant 7 : index
    %c0_81 = arith.constant 0 : index
    %86 = vector.load %arg14[%c7_80, %c0_81] : memref<48x16xf32, #tpu.memory_space<vmem>>, vector<4x16xf32>
    %c8_82 = arith.constant 8 : index
    %c0_83 = arith.constant 0 : index
    %87 = vector.load %arg14[%c8_82, %c0_83] : memref<48x16xf32, #tpu.memory_space<vmem>>, vector<4x16xf32>
    %c9_84 = arith.constant 9 : index
    %c0_85 = arith.constant 0 : index
    %88 = vector.load %arg14[%c9_84, %c0_85] : memref<48x16xf32, #tpu.memory_space<vmem>>, vector<4x16xf32>
    %89 = tpu.concatenate %86, %87, %88 in 1 : vector<4x16xf32>, vector<4x16xf32>, vector<4x16xf32> -> vector<4x48xf32>
    %c31_86 = arith.constant 31 : index
    %c0_87 = arith.constant 0 : index
    %90 = vector.load %arg14[%c31_86, %c0_87] : memref<48x16xf32, #tpu.memory_space<vmem>>, vector<4x16xf32>
    %c32_88 = arith.constant 32 : index
    %c0_89 = arith.constant 0 : index
    %91 = vector.load %arg14[%c32_88, %c0_89] : memref<48x16xf32, #tpu.memory_space<vmem>>, vector<4x16xf32>
    %c33_90 = arith.constant 33 : index
    %c0_91 = arith.constant 0 : index
    %92 = vector.load %arg14[%c33_90, %c0_91] : memref<48x16xf32, #tpu.memory_space<vmem>>, vector<4x16xf32>
    %93 = tpu.concatenate %90, %91, %92 in 1 : vector<4x16xf32>, vector<4x16xf32>, vector<4x16xf32> -> vector<4x48xf32>
    %94 = tpu.concatenate %89, %93 in 0 : vector<4x48xf32>, vector<4x48xf32> -> vector<8x48xf32>
    %cst_92 = arith.constant dense<0.000000e+00> : vector<8x16xf32>
    %95 = tpu.matmul %94, %83, %cst_92 {dimension_numbers = #tpu.dot_dimension_numbers<[1], [0], [0], [1], [0, 0, 1, 1], [], []>} : vector<8x48xf32>, vector<48x16xf32>, vector<8x16xf32> -> vector<8x16xf32>
    %96 = vector.broadcast %85 : vector<1x16xf32> to vector<8x16xf32>
    %97 = arith.addf %95, %96 : vector<8x16xf32>
    %cst_93 = arith.constant 0.000000e+00 : f32
    %98 = vector.broadcast %cst_93 : f32 to vector<8x16xf32>
    %99 = arith.cmpf oge, %97, %98 : vector<8x16xf32>
    %cst_94 = arith.constant 2.000000e-01 : f32
    %100 = vector.broadcast %cst_94 : f32 to vector<8x16xf32>
    %101 = arith.mulf %100, %97 : vector<8x16xf32>
    %102 = arith.select %99, %97, %101 : vector<8x16xi1>, vector<8x16xf32>
    %103 = vector.extract_strided_slice %102 {offsets = [0, 0], sizes = [4, 16], strides = [1, 1]} : vector<8x16xf32> to vector<4x16xf32>
    %c8_95 = arith.constant 8 : index
    %c0_96 = arith.constant 0 : index
    %104 = vector.load %arg15[%c8_95, %c0_96] : memref<48x16xf32, #tpu.memory_space<vmem>>, vector<4x16xf32>
    tpu.vector_store %arg15[%c8_95, %c0_96], %103 {strides = array<i32>} : memref<48x16xf32, #tpu.memory_space<vmem>>, vector<4x16xf32>,
    %105 = vector.extract_strided_slice %102 {offsets = [4, 0], sizes = [4, 16], strides = [1, 1]} : vector<8x16xf32> to vector<4x16xf32>
    %c32_97 = arith.constant 32 : index
    %c0_98 = arith.constant 0 : index
    %106 = vector.load %arg15[%c32_97, %c0_98] : memref<48x16xf32, #tpu.memory_space<vmem>>, vector<4x16xf32>
    tpu.vector_store %arg15[%c32_97, %c0_98], %105 {strides = array<i32>} : memref<48x16xf32, #tpu.memory_space<vmem>>, vector<4x16xf32>,
    %c1_99 = arith.constant 1 : index
    %c0_100 = arith.constant 0 : index
    %c0_101 = arith.constant 0 : index
    %107 = vector.load %arg6[%c1_99, %c0_100, %c0_101] : memref<3x48x16xf32, #tpu.memory_space<vmem>>, vector<1x48x16xf32>
    %108 = vector.shape_cast %107 : vector<1x48x16xf32> to vector<48x16xf32>
    %c1_102 = arith.constant 1 : index
    %c0_103 = arith.constant 0 : index
    %c0_104 = arith.constant 0 : index
    %109 = vector.load %arg7[%c1_102, %c0_103, %c0_104] : memref<3x1x16xf32, #tpu.memory_space<vmem>>, vector<1x1x16xf32>
    %110 = vector.shape_cast %109 : vector<1x1x16xf32> to vector<1x16xf32>
    %c7_105 = arith.constant 7 : index
    %c0_106 = arith.constant 0 : index
    %111 = vector.load %arg15[%c7_105, %c0_106] : memref<48x16xf32, #tpu.memory_space<vmem>>, vector<4x16xf32>
    %c8_107 = arith.constant 8 : index
    %c0_108 = arith.constant 0 : index
    %112 = vector.load %arg15[%c8_107, %c0_108] : memref<48x16xf32, #tpu.memory_space<vmem>>, vector<4x16xf32>
    %c9_109 = arith.constant 9 : index
    %c0_110 = arith.constant 0 : index
    %113 = vector.load %arg15[%c9_109, %c0_110] : memref<48x16xf32, #tpu.memory_space<vmem>>, vector<4x16xf32>
    %114 = tpu.concatenate %111, %112, %113 in 1 : vector<4x16xf32>, vector<4x16xf32>, vector<4x16xf32> -> vector<4x48xf32>
    %c31_111 = arith.constant 31 : index
    %c0_112 = arith.constant 0 : index
    %115 = vector.load %arg15[%c31_111, %c0_112] : memref<48x16xf32, #tpu.memory_space<vmem>>, vector<4x16xf32>
    %c32_113 = arith.constant 32 : index
    %c0_114 = arith.constant 0 : index
    %116 = vector.load %arg15[%c32_113, %c0_114] : memref<48x16xf32, #tpu.memory_space<vmem>>, vector<4x16xf32>
    %c33_115 = arith.constant 33 : index
    %c0_116 = arith.constant 0 : index
    %117 = vector.load %arg15[%c33_115, %c0_116] : memref<48x16xf32, #tpu.memory_space<vmem>>, vector<4x16xf32>
    %118 = tpu.concatenate %115, %116, %117 in 1 : vector<4x16xf32>, vector<4x16xf32>, vector<4x16xf32> -> vector<4x48xf32>
    %119 = tpu.concatenate %114, %118 in 0 : vector<4x48xf32>, vector<4x48xf32> -> vector<8x48xf32>
    %cst_117 = arith.constant dense<0.000000e+00> : vector<8x16xf32>
    %120 = tpu.matmul %119, %108, %cst_117 {dimension_numbers = #tpu.dot_dimension_numbers<[1], [0], [0], [1], [0, 0, 1, 1], [], []>} : vector<8x48xf32>, vector<48x16xf32>, vector<8x16xf32> -> vector<8x16xf32>
    %121 = vector.broadcast %110 : vector<1x16xf32> to vector<8x16xf32>
    %122 = arith.addf %120, %121 : vector<8x16xf32>
    %cst_118 = arith.constant 0.000000e+00 : f32
    %123 = vector.broadcast %cst_118 : f32 to vector<8x16xf32>
    %124 = arith.cmpf oge, %122, %123 : vector<8x16xf32>
    %cst_119 = arith.constant 2.000000e-01 : f32
    %125 = vector.broadcast %cst_119 : f32 to vector<8x16xf32>
    %126 = arith.mulf %125, %122 : vector<8x16xf32>
    %127 = arith.select %124, %122, %126 : vector<8x16xi1>, vector<8x16xf32>
    %128 = arith.addf %77, %127 : vector<8x16xf32>
    %129 = vector.extract_strided_slice %128 {offsets = [0, 0], sizes = [4, 16], strides = [1, 1]} : vector<8x16xf32> to vector<4x16xf32>
    %c8_120 = arith.constant 8 : index
    %c0_121 = arith.constant 0 : index
    %130 = vector.load %arg14[%c8_120, %c0_121] : memref<48x16xf32, #tpu.memory_space<vmem>>, vector<4x16xf32>
    tpu.vector_store %arg14[%c8_120, %c0_121], %129 {strides = array<i32>} : memref<48x16xf32, #tpu.memory_space<vmem>>, vector<4x16xf32>,
    %131 = vector.extract_strided_slice %128 {offsets = [4, 0], sizes = [4, 16], strides = [1, 1]} : vector<8x16xf32> to vector<4x16xf32>
    %c32_122 = arith.constant 32 : index
    %c0_123 = arith.constant 0 : index
    %132 = vector.load %arg14[%c32_122, %c0_123] : memref<48x16xf32, #tpu.memory_space<vmem>>, vector<4x16xf32>
    tpu.vector_store %arg14[%c32_122, %c0_123], %131 {strides = array<i32>} : memref<48x16xf32, #tpu.memory_space<vmem>>, vector<4x16xf32>,
    %c2 = arith.constant 2 : index
    %c0_124 = arith.constant 0 : index
    %c0_125 = arith.constant 0 : index
    %133 = vector.load %arg4[%c2, %c0_124, %c0_125] : memref<3x48x16xf32, #tpu.memory_space<vmem>>, vector<1x48x16xf32>
    %134 = vector.shape_cast %133 : vector<1x48x16xf32> to vector<48x16xf32>
    %c2_126 = arith.constant 2 : index
    %c0_127 = arith.constant 0 : index
    %c0_128 = arith.constant 0 : index
    %135 = vector.load %arg5[%c2_126, %c0_127, %c0_128] : memref<3x1x16xf32, #tpu.memory_space<vmem>>, vector<1x1x16xf32>
    %136 = vector.shape_cast %135 : vector<1x1x16xf32> to vector<1x16xf32>
    %c7_129 = arith.constant 7 : index
    %c0_130 = arith.constant 0 : index
    %137 = vector.load %arg14[%c7_129, %c0_130] : memref<48x16xf32, #tpu.memory_space<vmem>>, vector<4x16xf32>
    %c8_131 = arith.constant 8 : index
    %c0_132 = arith.constant 0 : index
    %138 = vector.load %arg14[%c8_131, %c0_132] : memref<48x16xf32, #tpu.memory_space<vmem>>, vector<4x16xf32>
    %c9_133 = arith.constant 9 : index
    %c0_134 = arith.constant 0 : index
    %139 = vector.load %arg14[%c9_133, %c0_134] : memref<48x16xf32, #tpu.memory_space<vmem>>, vector<4x16xf32>
    %140 = tpu.concatenate %137, %138, %139 in 1 : vector<4x16xf32>, vector<4x16xf32>, vector<4x16xf32> -> vector<4x48xf32>
    %c31_135 = arith.constant 31 : index
    %c0_136 = arith.constant 0 : index
    %141 = vector.load %arg14[%c31_135, %c0_136] : memref<48x16xf32, #tpu.memory_space<vmem>>, vector<4x16xf32>
    %c32_137 = arith.constant 32 : index
    %c0_138 = arith.constant 0 : index
    %142 = vector.load %arg14[%c32_137, %c0_138] : memref<48x16xf32, #tpu.memory_space<vmem>>, vector<4x16xf32>
    %c33_139 = arith.constant 33 : index
    %c0_140 = arith.constant 0 : index
    %143 = vector.load %arg14[%c33_139, %c0_140] : memref<48x16xf32, #tpu.memory_space<vmem>>, vector<4x16xf32>
    %144 = tpu.concatenate %141, %142, %143 in 1 : vector<4x16xf32>, vector<4x16xf32>, vector<4x16xf32> -> vector<4x48xf32>
    %145 = tpu.concatenate %140, %144 in 0 : vector<4x48xf32>, vector<4x48xf32> -> vector<8x48xf32>
    %cst_141 = arith.constant dense<0.000000e+00> : vector<8x16xf32>
    %146 = tpu.matmul %145, %134, %cst_141 {dimension_numbers = #tpu.dot_dimension_numbers<[1], [0], [0], [1], [0, 0, 1, 1], [], []>} : vector<8x48xf32>, vector<48x16xf32>, vector<8x16xf32> -> vector<8x16xf32>
    %147 = vector.broadcast %136 : vector<1x16xf32> to vector<8x16xf32>
    %148 = arith.addf %146, %147 : vector<8x16xf32>
    %cst_142 = arith.constant 0.000000e+00 : f32
    %149 = vector.broadcast %cst_142 : f32 to vector<8x16xf32>
    %150 = arith.cmpf oge, %148, %149 : vector<8x16xf32>
    %cst_143 = arith.constant 2.000000e-01 : f32
    %151 = vector.broadcast %cst_143 : f32 to vector<8x16xf32>
    %152 = arith.mulf %151, %148 : vector<8x16xf32>
    %153 = arith.select %150, %148, %152 : vector<8x16xi1>, vector<8x16xf32>
    %154 = vector.extract_strided_slice %153 {offsets = [0, 0], sizes = [4, 16], strides = [1, 1]} : vector<8x16xf32> to vector<4x16xf32>
    %c8_144 = arith.constant 8 : index
    %c0_145 = arith.constant 0 : index
    %155 = vector.load %arg15[%c8_144, %c0_145] : memref<48x16xf32, #tpu.memory_space<vmem>>, vector<4x16xf32>
    tpu.vector_store %arg15[%c8_144, %c0_145], %154 {strides = array<i32>} : memref<48x16xf32, #tpu.memory_space<vmem>>, vector<4x16xf32>,
    %156 = vector.extract_strided_slice %153 {offsets = [4, 0], sizes = [4, 16], strides = [1, 1]} : vector<8x16xf32> to vector<4x16xf32>
    %c32_146 = arith.constant 32 : index
    %c0_147 = arith.constant 0 : index
    %157 = vector.load %arg15[%c32_146, %c0_147] : memref<48x16xf32, #tpu.memory_space<vmem>>, vector<4x16xf32>
    tpu.vector_store %arg15[%c32_146, %c0_147], %156 {strides = array<i32>} : memref<48x16xf32, #tpu.memory_space<vmem>>, vector<4x16xf32>,
    %c2_148 = arith.constant 2 : index
    %c0_149 = arith.constant 0 : index
    %c0_150 = arith.constant 0 : index
    %158 = vector.load %arg6[%c2_148, %c0_149, %c0_150] : memref<3x48x16xf32, #tpu.memory_space<vmem>>, vector<1x48x16xf32>
    %159 = vector.shape_cast %158 : vector<1x48x16xf32> to vector<48x16xf32>
    %c2_151 = arith.constant 2 : index
    %c0_152 = arith.constant 0 : index
    %c0_153 = arith.constant 0 : index
    %160 = vector.load %arg7[%c2_151, %c0_152, %c0_153] : memref<3x1x16xf32, #tpu.memory_space<vmem>>, vector<1x1x16xf32>
    %161 = vector.shape_cast %160 : vector<1x1x16xf32> to vector<1x16xf32>
    %c7_154 = arith.constant 7 : index
    %c0_155 = arith.constant 0 : index
    %162 = vector.load %arg15[%c7_154, %c0_155] : memref<48x16xf32, #tpu.memory_space<vmem>>, vector<4x16xf32>
    %c8_156 = arith.constant 8 : index
    %c0_157 = arith.constant 0 : index
    %163 = vector.load %arg15[%c8_156, %c0_157] : memref<48x16xf32, #tpu.memory_space<vmem>>, vector<4x16xf32>
    %c9_158 = arith.constant 9 : index
    %c0_159 = arith.constant 0 : index
    %164 = vector.load %arg15[%c9_158, %c0_159] : memref<48x16xf32, #tpu.memory_space<vmem>>, vector<4x16xf32>
    %165 = tpu.concatenate %162, %163, %164 in 1 : vector<4x16xf32>, vector<4x16xf32>, vector<4x16xf32> -> vector<4x48xf32>
    %c31_160 = arith.constant 31 : index
    %c0_161 = arith.constant 0 : index
    %166 = vector.load %arg15[%c31_160, %c0_161] : memref<48x16xf32, #tpu.memory_space<vmem>>, vector<4x16xf32>
    %c32_162 = arith.constant 32 : index
    %c0_163 = arith.constant 0 : index
    %167 = vector.load %arg15[%c32_162, %c0_163] : memref<48x16xf32, #tpu.memory_space<vmem>>, vector<4x16xf32>
    %c33_164 = arith.constant 33 : index
    %c0_165 = arith.constant 0 : index
    %168 = vector.load %arg15[%c33_164, %c0_165] : memref<48x16xf32, #tpu.memory_space<vmem>>, vector<4x16xf32>
    %169 = tpu.concatenate %166, %167, %168 in 1 : vector<4x16xf32>, vector<4x16xf32>, vector<4x16xf32> -> vector<4x48xf32>
    %170 = tpu.concatenate %165, %169 in 0 : vector<4x48xf32>, vector<4x48xf32> -> vector<8x48xf32>
    %cst_166 = arith.constant dense<0.000000e+00> : vector<8x16xf32>
    %171 = tpu.matmul %170, %159, %cst_166 {dimension_numbers = #tpu.dot_dimension_numbers<[1], [0], [0], [1], [0, 0, 1, 1], [], []>} : vector<8x48xf32>, vector<48x16xf32>, vector<8x16xf32> -> vector<8x16xf32>
    %172 = vector.broadcast %161 : vector<1x16xf32> to vector<8x16xf32>
    %173 = arith.addf %171, %172 : vector<8x16xf32>
    %cst_167 = arith.constant 0.000000e+00 : f32
    %174 = vector.broadcast %cst_167 : f32 to vector<8x16xf32>
    %175 = arith.cmpf oge, %173, %174 : vector<8x16xf32>
    %cst_168 = arith.constant 2.000000e-01 : f32
    %176 = vector.broadcast %cst_168 : f32 to vector<8x16xf32>
    %177 = arith.mulf %176, %173 : vector<8x16xf32>
    %178 = arith.select %175, %173, %177 : vector<8x16xi1>, vector<8x16xf32>
    %179 = arith.addf %128, %178 : vector<8x16xf32>
    %180 = vector.extract_strided_slice %179 {offsets = [0, 0], sizes = [4, 16], strides = [1, 1]} : vector<8x16xf32> to vector<4x16xf32>
    %c8_169 = arith.constant 8 : index
    %c0_170 = arith.constant 0 : index
    %181 = vector.load %arg14[%c8_169, %c0_170] : memref<48x16xf32, #tpu.memory_space<vmem>>, vector<4x16xf32>
    tpu.vector_store %arg14[%c8_169, %c0_170], %180 {strides = array<i32>} : memref<48x16xf32, #tpu.memory_space<vmem>>, vector<4x16xf32>,
    %182 = vector.extract_strided_slice %179 {offsets = [4, 0], sizes = [4, 16], strides = [1, 1]} : vector<8x16xf32> to vector<4x16xf32>
    %c32_171 = arith.constant 32 : index
    %c0_172 = arith.constant 0 : index
    %183 = vector.load %arg14[%c32_171, %c0_172] : memref<48x16xf32, #tpu.memory_space<vmem>>, vector<4x16xf32>
    tpu.vector_store %arg14[%c32_171, %c0_172], %182 {strides = array<i32>} : memref<48x16xf32, #tpu.memory_space<vmem>>, vector<4x16xf32>,
    %c0_173 = arith.constant 0 : index
    %c0_174 = arith.constant 0 : index
    %184 = vector.load %arg8[%c0_173, %c0_174] : memref<48x384xf32, #tpu.memory_space<vmem>>, vector<48x384xf32>
    %c0_175 = arith.constant 0 : index
    %c0_176 = arith.constant 0 : index
    %185 = vector.load %arg9[%c0_175, %c0_176] : memref<1x384xf32, #tpu.memory_space<vmem>>, vector<1x384xf32>
    %c7_177 = arith.constant 7 : index
    %c0_178 = arith.constant 0 : index
    %186 = vector.load %arg14[%c7_177, %c0_178] : memref<48x16xf32, #tpu.memory_space<vmem>>, vector<4x16xf32>
    %c8_179 = arith.constant 8 : index
    %c0_180 = arith.constant 0 : index
    %187 = vector.load %arg14[%c8_179, %c0_180] : memref<48x16xf32, #tpu.memory_space<vmem>>, vector<4x16xf32>
    %c9_181 = arith.constant 9 : index
    %c0_182 = arith.constant 0 : index
    %188 = vector.load %arg14[%c9_181, %c0_182] : memref<48x16xf32, #tpu.memory_space<vmem>>, vector<4x16xf32>
    %189 = tpu.concatenate %186, %187, %188 in 1 : vector<4x16xf32>, vector<4x16xf32>, vector<4x16xf32> -> vector<4x48xf32>
    %c31_183 = arith.constant 31 : index
    %c0_184 = arith.constant 0 : index
    %190 = vector.load %arg14[%c31_183, %c0_184] : memref<48x16xf32, #tpu.memory_space<vmem>>, vector<4x16xf32>
    %c32_185 = arith.constant 32 : index
    %c0_186 = arith.constant 0 : index
    %191 = vector.load %arg14[%c32_185, %c0_186] : memref<48x16xf32, #tpu.memory_space<vmem>>, vector<4x16xf32>
    %c33_187 = arith.constant 33 : index
    %c0_188 = arith.constant 0 : index
    %192 = vector.load %arg14[%c33_187, %c0_188] : memref<48x16xf32, #tpu.memory_space<vmem>>, vector<4x16xf32>
    %193 = tpu.concatenate %190, %191, %192 in 1 : vector<4x16xf32>, vector<4x16xf32>, vector<4x16xf32> -> vector<4x48xf32>
    %194 = tpu.concatenate %189, %193 in 0 : vector<4x48xf32>, vector<4x48xf32> -> vector<8x48xf32>
    %cst_189 = arith.constant dense<0.000000e+00> : vector<8x384xf32>
    %195 = tpu.matmul %194, %184, %cst_189 {dimension_numbers = #tpu.dot_dimension_numbers<[1], [0], [0], [1], [0, 0, 1, 1], [], []>} : vector<8x48xf32>, vector<48x384xf32>, vector<8x384xf32> -> vector<8x384xf32>
    %196 = vector.broadcast %185 : vector<1x384xf32> to vector<8x384xf32>
    %197 = arith.addf %195, %196 : vector<8x384xf32>
    %c0_190 = arith.constant 0 : index
    %c0_191 = arith.constant 0 : index
    %198 = vector.load %arg10[%c0_190, %c0_191] : memref<48x128xf32, #tpu.memory_space<vmem>>, vector<48x128xf32>
    %c0_192 = arith.constant 0 : index
    %c0_193 = arith.constant 0 : index
    %199 = vector.load %arg11[%c0_192, %c0_193] : memref<1x128xf32, #tpu.memory_space<vmem>>, vector<1x128xf32>
    %c7_194 = arith.constant 7 : index
    %c0_195 = arith.constant 0 : index
    %200 = vector.load %arg14[%c7_194, %c0_195] : memref<48x16xf32, #tpu.memory_space<vmem>>, vector<4x16xf32>
    %c8_196 = arith.constant 8 : index
    %c0_197 = arith.constant 0 : index
    %201 = vector.load %arg14[%c8_196, %c0_197] : memref<48x16xf32, #tpu.memory_space<vmem>>, vector<4x16xf32>
    %c9_198 = arith.constant 9 : index
    %c0_199 = arith.constant 0 : index
    %202 = vector.load %arg14[%c9_198, %c0_199] : memref<48x16xf32, #tpu.memory_space<vmem>>, vector<4x16xf32>
    %203 = tpu.concatenate %200, %201, %202 in 1 : vector<4x16xf32>, vector<4x16xf32>, vector<4x16xf32> -> vector<4x48xf32>
    %c31_200 = arith.constant 31 : index
    %c0_201 = arith.constant 0 : index
    %204 = vector.load %arg14[%c31_200, %c0_201] : memref<48x16xf32, #tpu.memory_space<vmem>>, vector<4x16xf32>
    %c32_202 = arith.constant 32 : index
    %c0_203 = arith.constant 0 : index
    %205 = vector.load %arg14[%c32_202, %c0_203] : memref<48x16xf32, #tpu.memory_space<vmem>>, vector<4x16xf32>
    %c33_204 = arith.constant 33 : index
    %c0_205 = arith.constant 0 : index
    %206 = vector.load %arg14[%c33_204, %c0_205] : memref<48x16xf32, #tpu.memory_space<vmem>>, vector<4x16xf32>
    %207 = tpu.concatenate %204, %205, %206 in 1 : vector<4x16xf32>, vector<4x16xf32>, vector<4x16xf32> -> vector<4x48xf32>
    %208 = tpu.concatenate %203, %207 in 0 : vector<4x48xf32>, vector<4x48xf32> -> vector<8x48xf32>
    %cst_206 = arith.constant dense<0.000000e+00> : vector<8x128xf32>
    %209 = tpu.matmul %208, %198, %cst_206 {dimension_numbers = #tpu.dot_dimension_numbers<[1], [0], [0], [1], [0, 0, 1, 1], [], []>} : vector<8x48xf32>, vector<48x128xf32>, vector<8x128xf32> -> vector<8x128xf32>
    %210 = vector.broadcast %199 : vector<1x128xf32> to vector<8x128xf32>
    %211 = arith.addf %209, %210 : vector<8x128xf32>
    %212 = vector.extract_strided_slice %197 {offsets = [0, 0], sizes = [4, 384], strides = [1, 1]} : vector<8x384xf32> to vector<4x384xf32>
    %c0_207 = arith.constant 0 : index
    %c0_208 = arith.constant 0 : index
    %c0_209 = arith.constant 0 : index
    %213 = vector.load %arg12[%c0_207, %c0_208, %c0_209] : memref<2x4x384xf32, #tpu.memory_space<vmem>>, vector<1x4x384xf32>
    %214 = vector.shape_cast %213 : vector<1x4x384xf32> to vector<4x384xf32>
    %215 = vector.shape_cast %212 : vector<4x384xf32> to vector<1x4x384xf32>
    tpu.vector_store %arg12[%c0_207, %c0_208, %c0_209], %215 {strides = array<i32>} : memref<2x4x384xf32, #tpu.memory_space<vmem>>, vector<1x4x384xf32>,
    %216 = vector.extract_strided_slice %211 {offsets = [0, 0], sizes = [4, 128], strides = [1, 1]} : vector<8x128xf32> to vector<4x128xf32>
    %c0_210 = arith.constant 0 : index
    %c0_211 = arith.constant 0 : index
    %c0_212 = arith.constant 0 : index
    %217 = vector.load %arg13[%c0_210, %c0_211, %c0_212] : memref<2x4x128xf32, #tpu.memory_space<vmem>>, vector<1x4x128xf32>
    %218 = vector.shape_cast %217 : vector<1x4x128xf32> to vector<4x128xf32>
    %219 = vector.shape_cast %216 : vector<4x128xf32> to vector<1x4x128xf32>
    tpu.vector_store %arg13[%c0_210, %c0_211, %c0_212], %219 {strides = array<i32>} : memref<2x4x128xf32, #tpu.memory_space<vmem>>, vector<1x4x128xf32>,
    %220 = vector.extract_strided_slice %197 {offsets = [4, 0], sizes = [4, 384], strides = [1, 1]} : vector<8x384xf32> to vector<4x384xf32>
    %c1_213 = arith.constant 1 : index
    %c0_214 = arith.constant 0 : index
    %c0_215 = arith.constant 0 : index
    %221 = vector.load %arg12[%c1_213, %c0_214, %c0_215] : memref<2x4x384xf32, #tpu.memory_space<vmem>>, vector<1x4x384xf32>
    %222 = vector.shape_cast %221 : vector<1x4x384xf32> to vector<4x384xf32>
    %223 = vector.shape_cast %220 : vector<4x384xf32> to vector<1x4x384xf32>
    tpu.vector_store %arg12[%c1_213, %c0_214, %c0_215], %223 {strides = array<i32>} : memref<2x4x384xf32, #tpu.memory_space<vmem>>, vector<1x4x384xf32>,
    %224 = vector.extract_strided_slice %211 {offsets = [4, 0], sizes = [4, 128], strides = [1, 1]} : vector<8x128xf32> to vector<4x128xf32>
    %c1_216 = arith.constant 1 : index
    %c0_217 = arith.constant 0 : index
    %c0_218 = arith.constant 0 : index
    %225 = vector.load %arg13[%c1_216, %c0_217, %c0_218] : memref<2x4x128xf32, #tpu.memory_space<vmem>>, vector<1x4x128xf32>
    %226 = vector.shape_cast %225 : vector<1x4x128xf32> to vector<4x128xf32>
    %227 = vector.shape_cast %224 : vector<4x128xf32> to vector<1x4x128xf32>
    tpu.vector_store %arg13[%c1_216, %c0_217, %c0_218], %227 {strides = array<i32>} : memref<2x4x128xf32, #tpu.memory_space<vmem>>, vector<1x4x128xf32>,
    return
  }
  func.func @transform_0(%arg0: i32) -> (i32, i32) {
    %c0_i32 = arith.constant 0 : i32
    %c0_i32_0 = arith.constant 0 : i32
    %c0_i32_1 = arith.constant 0 : i32
    return %c0_i32, %c0_i32_0 : i32, i32
  }
  func.func @transform_1(%arg0: i32) -> (i32, i32) {
    %c0_i32 = arith.constant 0 : i32
    %c0_i32_0 = arith.constant 0 : i32
    %c0_i32_1 = arith.constant 0 : i32
    return %c0_i32, %c0_i32_0 : i32, i32
  }
  func.func @transform_2(%arg0: i32) -> (i32, i32) {
    %c0_i32 = arith.constant 0 : i32
    %c0_i32_0 = arith.constant 0 : i32
    %c0_i32_1 = arith.constant 0 : i32
    return %c0_i32, %c0_i32_0 : i32, i32
  }
  func.func @transform_3(%arg0: i32) -> (i32, i32, i32) {
    %c0_i32 = arith.constant 0 : i32
    %c0_i32_0 = arith.constant 0 : i32
    %c0_i32_1 = arith.constant 0 : i32
    %c0_i32_2 = arith.constant 0 : i32
    return %c0_i32, %c0_i32_0, %c0_i32_1 : i32, i32, i32
  }
  func.func @transform_4(%arg0: i32) -> (i32, i32, i32) {
    %c0_i32 = arith.constant 0 : i32
    %c0_i32_0 = arith.constant 0 : i32
    %c0_i32_1 = arith.constant 0 : i32
    %c0_i32_2 = arith.constant 0 : i32
    return %c0_i32, %c0_i32_0, %c0_i32_1 : i32, i32, i32
  }
  func.func @transform_5(%arg0: i32) -> (i32, i32, i32) {
    %c0_i32 = arith.constant 0 : i32
    %c0_i32_0 = arith.constant 0 : i32
    %c0_i32_1 = arith.constant 0 : i32
    %c0_i32_2 = arith.constant 0 : i32
    return %c0_i32, %c0_i32_0, %c0_i32_1 : i32, i32, i32
  }
  func.func @transform_6(%arg0: i32) -> (i32, i32, i32) {
    %c0_i32 = arith.constant 0 : i32
    %c0_i32_0 = arith.constant 0 : i32
    %c0_i32_1 = arith.constant 0 : i32
    %c0_i32_2 = arith.constant 0 : i32
    return %c0_i32, %c0_i32_0, %c0_i32_1 : i32, i32, i32
  }
  func.func @transform_7(%arg0: i32) -> (i32, i32) {
    %c0_i32 = arith.constant 0 : i32
    %c0_i32_0 = arith.constant 0 : i32
    %c0_i32_1 = arith.constant 0 : i32
    return %c0_i32, %c0_i32_0 : i32, i32
  }
  func.func @transform_8(%arg0: i32) -> (i32, i32) {
    %c0_i32 = arith.constant 0 : i32
    %c0_i32_0 = arith.constant 0 : i32
    %c0_i32_1 = arith.constant 0 : i32
    return %c0_i32, %c0_i32_0 : i32, i32
  }
  func.func @transform_9(%arg0: i32) -> (i32, i32) {
    %c0_i32 = arith.constant 0 : i32
    %c0_i32_0 = arith.constant 0 : i32
    %c0_i32_1 = arith.constant 0 : i32
    return %c0_i32, %c0_i32_0 : i32, i32
  }
  func.func @transform_10(%arg0: i32) -> (i32, i32) {
    %c0_i32 = arith.constant 0 : i32
    %c0_i32_0 = arith.constant 0 : i32
    %c0_i32_1 = arith.constant 0 : i32
    return %c0_i32, %c0_i32_0 : i32, i32
  }
  func.func @transform_11(%arg0: i32) -> (i32, i32, i32) {
    %c0_i32 = arith.constant 0 : i32
    %c0_i32_0 = arith.constant 0 : i32
    %c0_i32_1 = arith.constant 0 : i32
    %c0_i32_2 = arith.constant 0 : i32
    return %c0_i32, %c0_i32_0, %c0_i32_1 : i32, i32, i32
  }
  func.func @transform_12(%arg0: i32) -> (i32, i32, i32) {
    %c0_i32 = arith.constant 0 : i32
    %c0_i32_0 = arith.constant 0 : i32
    %c0_i32_1 = arith.constant 0 : i32
    %c0_i32_2 = arith.constant 0 : i32
    return %c0_i32, %c0_i32_0, %c0_i32_1 : i32, i32, i32
  }
}

</mosaic_0001>

<bundles_post_ra>
// kernel: tpu_custom_call.1
= control target key start
LH: loop header
LB: loop body
LE: loop exit
PB: predicated region body
PF: predicated region fallthrough
CT: control target
= control target key end

     0   :  { %18 = vsyncpa [#allocation5], 0  ;;  %s1578_s25 = smov 4   ;;  %vm42_vm0 = vcmask 130048   ;;  %vm115_vm1 = vcmask 1043456   ;;  %s1579_s30 = smov 8   ;;  %s2105_s0 = inlined_call_operand.vmem [shape: f32[48,4], index: 0, kind: input, shape index: {}]   ;;  %s2106_s1 = inlined_call_operand.vmem [shape: f32[20,16], index: 1, kind: input, shape index: {}]   ;;  %s2107_s2 = inlined_call_operand.vmem [shape: f32[1,16], index: 2, kind: input, shape index: {}]   ;;  %s2108_s3 = inlined_call_operand.vmem [shape: f32[3,48,16], index: 3, kind: input, shape index: {}]   ;;  %s2109_s4 = inlined_call_operand.vmem [shape: f32[3,1,16], index: 4, kind: input, shape index: {}]   ;;  %s2110_s5 = inlined_call_operand.vmem [shape: f32[3,48,16], index: 5, kind: input, shape index: {}]   ;;  %s2111_s6 = inlined_call_operand.vmem [shape: f32[3,1,16], index: 6, kind: input, shape index: {}]   ;;  %s2112_s7 = inlined_call_operand.vmem [shape: f32[48,384], index: 7, kind: input, shape index: {}]   ;;  %s2113_s8 = inlined_call_operand.vmem [shape: f32[1,384], index: 8, kind: input, shape index: {}]   ;;  %s2114_s9 = inlined_call_operand.vmem [shape: f32[48,128], index: 9, kind: input, shape index: {}]   ;;  %s2115_s10 = inlined_call_operand.vmem [shape: f32[1,128], index: 10, kind: input, shape index: {}]   ;;  %s2116_s11 = inlined_call_operand.hbm [shape: f32[2,4,384], index: 11, kind: output, shape index: {0}]   ;;  %s2117_s12 = inlined_call_operand.hbm [shape: f32[2,4,128], index: 12, kind: output, shape index: {1}]  }
   0x1   :  { %v88_v0 = vld [vmem:[%s2105_s0 + $0x1f] sm:$0xf]  ;;  %v60_v1 = vld [vmem:[%s2105_s0 + $0x7] sm:$0xf]  ;;  %s1580_s13 = smov 12   ;;  %v1581_v4 = vmov 0.0  }
   0x2   :  { %93 = vrot.lane.b32.xlu0 %v88_v0, %s1578_s25  ;;  %65 = vrot.lane.b32.xlu1 %v60_v1, %s1578_s25  ;;  %v89_v2 = vld [vmem:[%s2105_s0 + $0x20] sm:$0xf]  ;;  %43 = vst.msk [vmem:[#allocation2] sm:$0xff] %vm42_vm0, %v1581_v4  ;;  %44 = vst.msk [vmem:[#allocation2 + $0x8] sm:$0xff] %vm42_vm0, %v1581_v4  ;;  %v57_v5 = vld [vmem:[%s2106_s1 + $0x10] sm:$0xf] }
   0x3   :  { %v90_v3 = vld [vmem:[%s2105_s0 + $0x21] sm:$0xf]  ;;  %46 = vst.msk [vmem:[#allocation2 + $0x18] sm:$0xff] %vm42_vm0, %v1581_v4  ;;  %47 = vst.msk [vmem:[#allocation2 + $0x20] sm:$0xff] %vm42_vm0, %v1581_v4  ;;  %v61_v6 = vld [vmem:[%s2105_s0 + $0x8] sm:$0xf]  ;;  %1394 = vmatprep.subr.mxu0 %v1581_v4 }
   0x4   :  { %49 = vst.msk [vmem:[#allocation3] sm:$0xff] %vm42_vm0, %v1581_v4  ;;  %50 = vst.msk [vmem:[#allocation3 + $0x8] sm:$0xff] %vm42_vm0, %v1581_v4  ;;  %v91_v7 = vld [vmem:[%s2105_s0 + $0x22] sm:$0xf]  ;;  %vm1582_vm2 = vmmov 0  }
   0x5   :  { %52 = vst.msk [vmem:[#allocation3 + $0x18] sm:$0xff] %vm42_vm0, %v1581_v4  ;;  %53 = vst.msk [vmem:[#allocation3 + $0x20] sm:$0xff] %vm42_vm0, %v1581_v4  ;;  %1400 = vmatprep.mubr.msk.f32.mxu0 %vm1582_vm2, %v1581_v4 }
   0x6   :  { %97 = vrot.lane.b32.xlu0 %v89_v2, %s1579_s30  ;;  %101 = vrot.lane.b32.xlu1 %v90_v3, %s1580_s13 }
   0x7   :  { %19 = vsyncpa [#allocation7], 0  ;;  %1395 = vmatpush3.msk.msra.mxu0 %vm115_vm1, %v57_v5  ;;  %v56_v8 = vld [vmem:[%s2106_s1 + $0x8] sm:$0xff]  ;;  %1403 = vmatprep.subr.mxu1 %v1581_v4  ;;  %s1583_s22 = smov 16   ;;  %v55_v9 = vld [vmem:[%s2106_s1] sm:$0xff]  ;;  %vm80_vm3 = vcmask 31744  }
   0x8   :  { %1396 = vmatprep.subr.mxu0 %v1581_v4  ;;  %1415 = vmatprep.mubr.msk.f32.mxu1 %vm1582_vm2, %v1581_v4  ;;  %v62_v10 = vld [vmem:[%s2105_s0 + $0x9] sm:$0xf]  ;;  %v87_v14 = vld [vmem:[%s2105_s0 + $0x1e] sm:$0xf]  ;;  %vm82_vm4 = vcmask 64512   ;;  %vm84_vm5 = vcmask 97280  }
   0x9   :  { %v63_v11 = vld [vmem:[%s2105_s0 + $0xa] sm:$0xf]  ;;  %1397 = vmatpush3.msra.mxu0 %v56_v8  ;;  %v59_v19 = vld [vmem:[%s2105_s0 + $0x6] sm:$0xf]  ;;  %vm123_vm6 = vcmask 162816   ;;  %v210_v37 = vld [vmem:[%s2108_s3 + $0x18] sm:$0xff] }
   0xa   :  { %69 = vrot.lane.b32.xlu0 %v61_v6, %s1579_s30  ;;  %105 = vrot.lane.b32.xlu1 %v91_v7, %s1583_s22  ;;  %v212_v32 = vld [vmem:[%s2108_s3 + $0x28] sm:$0xff]  ;;  %v211_v33 = vld [vmem:[%s2108_s3 + $0x20] sm:$0xff]  ;;  %vm203_vm8 = vcmask 125952   ;;  %vm205_vm9 = vcmask 130052   ;;  %s1584_s1 = smov 32   ;;  %vm226_vm10 = vcmask 261120  }
   0xb   :  { %1398 = vmatprep.subr.mxu0 %v1581_v4  ;;  %1404 = vmatpush3.msra.mxu1 %v212_v32  ;;  %v1287_v34 = vld [vmem:[%s2107_s2] ss:$0 sm:$0xff]  ;;  %v209_v40 = vld [vmem:[%s2108_s3 + $0x10] sm:$0xff]  ;;  %v208_v42 = vld [vmem:[%s2108_s3 + $0x8] sm:$0xff]  ;;  %vm251_vm11 = vcmask 392192  }
   0xc   :  { %1399 = vmatpush3.msra.mxu0 %v55_v9  ;;  %1405 = vmatprep.subr.mxu1 %v1581_v4  ;;  %v207_v43 = vld [vmem:[%s2108_s3] sm:$0xff]  ;;  %v335_v60 = vld [vmem:[%s2110_s5 + $0x28] sm:$0xff]  ;;  %v333_v1 = vld [vmem:[%s2110_s5 + $0x18] sm:$0xff] }
   0xd   :  { %1418 = vmatprep.subr.mxu0 %v1581_v4  ;;  %1406 = vmatpush3.msra.mxu1 %v211_v33  ;;  %v334_v61 = vld [vmem:[%s2110_s5 + $0x20] sm:$0xff]  ;;  %v332_v5 = vld [vmem:[%s2110_s5 + $0x10] sm:$0xff]  ;;  %v331_v7 = vld [vmem:[%s2110_s5 + $0x8] sm:$0xff] }
   0xe   :  { %73 = vrot.lane.b32.xlu0 %v62_v10, %s1580_s13  ;;  %77 = vrot.lane.b32.xlu1 %v63_v11, %s1583_s22  ;;  %v1290_v62 = vld [vmem:[%s2109_s4] ss:$0 sm:$0xff]  ;;  %v1297_v32 = vld [vmem:[%s2108_s3 + $0x48] sm:$0xff] }
   0xf   :  { %1407 = vmatprep.subr.mxu1 %v1581_v4  ;;  %v330_v8 = vld [vmem:[%s2110_s5] sm:$0xff] }
  0x10   :  { %1408 = vmatpush3.msra.mxu1 %v210_v37  ;;  %v1294_v37 = vld [vmem:[%s2108_s3 + $0x30] sm:$0xff] }
  0x11   :  { %1409 = vmatprep.subr.mxu1 %v1581_v4 }
  0x12   :  { %1410 = vmatpush3.msra.mxu1 %v209_v40 }
  0x13   :  { %1411 = vmatprep.subr.mxu1 %v1581_v4 }
  0x14   :  { %1412 = vmatpush3.msra.mxu1 %v208_v42 }
  0x15   :  { %1413 = vmatprep.subr.mxu1 %v1581_v4 }
  0x16   :  { %1414 = vmatpush3.msra.mxu1 %v207_v43 }
  0x17   :  { %1433 = vmatprep.subr.mxu1 %v1581_v4 }
  0x74   :  { %v94_v12 = vpop.permute.xlu0 %93  ;;  %v66_v13 = vpop.permute.xlu1 %65 }
  0x75   :  { %v108_v17 = vsel %vm80_vm3, %v87_v14, %v94_v12  ;;  %v81_v24 = vsel %vm80_vm3, %v59_v19, %v66_v13 }
  0x78   :  { %v98_v15 = vpop.permute.xlu0 %97  ;;  %v102_v16 = vpop.permute.xlu1 %101 }
  0x79   :  { %v109_v18 = vsel %vm82_vm4, %v108_v17, %v98_v15 }
  0x7a   :  { %v110_v22 = vsel %vm84_vm5, %v109_v18, %v102_v16 }
  0x7c   :  { %v70_v20 = vpop.permute.xlu0 %69  ;;  %v106_v21 = vpop.permute.xlu1 %105 }
  0x7d   :  { %v111_v23 = vsel %vm42_vm0, %v110_v22, %v106_v21  ;;  %v83_v25 = vsel %vm82_vm4, %v81_v24, %v70_v20 }
  0x7e   :  { %v113_v28 = vrot.slane %v111_v23, 4 }
  0x80   :  { %v74_v26 = vpop.permute.xlu0 %73  ;;  %v78_v27 = vpop.permute.xlu1 %77 }
  0x81   :  { %v85_v29 = vsel %vm84_vm5, %v83_v25, %v74_v26  ;;  %v1299_v25 = vld [vmem:[%s2108_s3 + $0x58] sm:$0xff]  ;;  %v1298_v26 = vld [vmem:[%s2108_s3 + $0x50] sm:$0xff] }
  0x82   :  { %v86_v30 = vsel %vm42_vm0, %v85_v29, %v78_v27  ;;  %v1292_v27 = vld [vmem:[%s2111_s6] ss:$0 sm:$0xff] }
  0x83   :  { %v116_v31 = vsel %vm115_vm1, %v86_v30, %v113_v28 }
  0x84   :  { %1401 = vmatmul.mubr.msk.f32.vlgmr.msra.gmra.mxu0 %vm123_vm6, %v116_v31 }
  0x85   :  { %1430 = vmatprep.mubr.msk.f32.mxu0 %vm1582_vm2, %v1581_v4  ;;  %1419 = vmatpush3.msra.mxu0 %v335_v60 }
  0x86   :  { %1420 = vmatprep.subr.mxu0 %v1581_v4 }
  0x87   :  { %1421 = vmatpush3.msra.mxu0 %v334_v61 }
  0x88   :  { %1422 = vmatprep.subr.mxu0 %v1581_v4 }
  0x89   :  { %1423 = vmatpush3.msra.mxu0 %v333_v1  ;;  %v1303_v1 = vld [vmem:[%s2110_s5 + $0x30] sm:$0xff] }
  0x8a   :  { %1424 = vmatprep.subr.mxu0 %v1581_v4 }
  0x8b   :  { %1425 = vmatpush3.msra.mxu0 %v332_v5 }
  0x8c   :  { %1426 = vmatprep.subr.mxu0 %v1581_v4 }
  0x8d   :  { %1427 = vmatpush3.msra.mxu0 %v331_v7 }
  0x8e   :  { %1428 = vmatprep.subr.mxu0 %v1581_v4 }
  0x8f   :  { %1429 = vmatpush3.msra.mxu0 %v330_v8 }
  0x90   :  { %1448 = vmatprep.subr.mxu0 %v1581_v4 }
 0x144   :  { %v196_v35 = vpop.f32.mrf.mxu0 }
 0x145   :  { %v197_v36 = vadd.f32 %v1287_v34, %v196_v35  ;;  %v1296_v34 = vld [vmem:[%s2108_s3 + $0x40] sm:$0xff] }
 0x146   :  { %v1402_v38 = vpop.f32.mrf.mxu0 }
 0x147   :  { %vm200_vm7 = vcmp.ge.f32.partialorder %v197_v36, 0.0  ;;  %v201_v39 = vmul.f32 0.2, %v197_v36 }
 0x149   :  { %v1748_v41 = vsel %vm200_vm7, %v197_v36, %v201_v39  ;;  %v1295_v36 = vld [vmem:[%s2108_s3 + $0x38] sm:$0xff] }
 0x14a   :  { %204 = vst.msk [vmem:[#allocation2 + $0x8] sm:$0xf] %vm203_vm8, %v1748_v41 }
 0x14b   :  { %206 = vst.msk [vmem:[#allocation2 + $0x1c] sm:$0xf0] %vm205_vm9, %v1748_v41 }
 0x151   :  { %v216_v46 = vld [vmem:[#allocation2 + $0x9] sm:$0xf] }
 0x152   :  { %v230_v44 = vld [vmem:[#allocation2 + $0x21] sm:$0xf]  ;;  %v215_v47 = vld [vmem:[#allocation2 + $0x8] sm:$0xf] }
 0x153   :  { %v229_v45 = vld [vmem:[#allocation2 + $0x20] sm:$0xf]  ;;  %236 = vrot.lane.b32.xlu1 %v230_v44, %s1584_s1  ;;  %v214_v55 = vld [vmem:[#allocation2 + $0x7] sm:$0xf] }
 0x154   :  { %232 = vrot.lane.b32.xlu0 %v229_v45, %s1583_s22  ;;  %v228_v50 = vld [vmem:[#allocation2 + $0x1f] sm:$0xf] }
 0x157   :  { %222 = vrot.lane.b32.xlu1 %v216_v46, %s1584_s1 }
 0x158   :  { %218 = vrot.lane.b32.xlu0 %v215_v47, %s1583_s22 }
 0x1c5   :  { %v237_v48 = vpop.permute.xlu1 %236 }
 0x1c6   :  { %v233_v49 = vpop.permute.xlu0 %232 }
 0x1c7   :  { %v239_v51 = vsel %vm42_vm0, %v228_v50, %v233_v49 }
 0x1c8   :  { %v240_v52 = vsel %vm226_vm10, %v239_v51, %v237_v48 }
 0x1c9   :  { %v223_v53 = vpop.permute.xlu1 %222  ;;  %v242_v56 = vrot.slane %v240_v52, 4 }
 0x1ca   :  { %v219_v54 = vpop.permute.xlu0 %218 }
 0x1cb   :  { %v225_v57 = vsel %vm42_vm0, %v214_v55, %v219_v54  ;;  %v1308_v54 = vld [vmem:[%s2110_s5 + $0x58] sm:$0xff]  ;;  %v1307_v55 = vld [vmem:[%s2110_s5 + $0x50] sm:$0xff] }
 0x1cc   :  { %v227_v58 = vsel %vm226_vm10, %v225_v57, %v223_v53 }
 0x1cd   :  { %v244_v59 = vsel %vm115_vm1, %v227_v58, %v242_v56  ;;  %v1301_v56 = vld [vmem:[%s2109_s4 + $0x1] ss:$0 sm:$0xff] }
 0x1ce   :  { %1416 = vmatmul.mubr.msk.f32.vlgmr.msra.gmra.mxu1 %vm251_vm11, %v244_v59  ;;  %v1306_v59 = vld [vmem:[%s2110_s5 + $0x48] sm:$0xff] }
 0x1cf   :  { %1445 = vmatprep.mubr.msk.f32.mxu1 %vm1582_vm2, %v1581_v4  ;;  %1434 = vmatpush3.msra.mxu1 %v1299_v25 }
 0x1d0   :  { %1435 = vmatprep.subr.mxu1 %v1581_v4 }
 0x1d1   :  { %1436 = vmatpush3.msra.mxu1 %v1298_v26  ;;  %v1315_v26 = vld [vmem:[%s2108_s3 + $0x78] sm:$0xff] }
 0x1d2   :  { %1437 = vmatprep.subr.mxu1 %v1581_v4 }
 0x1d3   :  { %1438 = vmatpush3.msra.mxu1 %v1297_v32 }
 0x1d4   :  { %1439 = vmatprep.subr.mxu1 %v1581_v4 }
 0x1d5   :  { %1440 = vmatpush3.msra.mxu1 %v1296_v34 }
 0x1d6   :  { %1441 = vmatprep.subr.mxu1 %v1581_v4 }
 0x1d7   :  { %1442 = vmatpush3.msra.mxu1 %v1295_v36 }
 0x1d8   :  { %1443 = vmatprep.subr.mxu1 %v1581_v4 }
 0x1d9   :  { %1444 = vmatpush3.msra.mxu1 %v1294_v37 }
 0x1da   :  { %1463 = vmatprep.subr.mxu1 %v1581_v4 }
 0x28e   :  { %v321_v63 = vpop.f32.mrf.mxu1 }
 0x28f   :  { %v322_v0 = vadd.f32 %v1290_v62, %v321_v63  ;;  %v1305_v62 = vld [vmem:[%s2110_s5 + $0x40] sm:$0xff] }
 0x290   :  { %v1417_v2 = vpop.f32.mrf.mxu1 }
 0x291   :  { %vm325_vm12 = vcmp.ge.f32.partialorder %v322_v0, 0.0  ;;  %v326_v3 = vmul.f32 0.2, %v322_v0 }
 0x293   :  { %v327_v6 = vsel %vm325_vm12, %v322_v0, %v326_v3  ;;  %v1304_v0 = vld [vmem:[%s2110_s5 + $0x38] sm:$0xff] }
 0x294   :  { %328 = vst.msk [vmem:[#allocation3 + $0x8] sm:$0xf] %vm203_vm8, %v327_v6 }
 0x295   :  { %329 = vst.msk [vmem:[#allocation3 + $0x1c] sm:$0xf0] %vm205_vm9, %v327_v6 }
 0x29b   :  { %v339_v11 = vld [vmem:[#allocation3 + $0x9] sm:$0xf] }
 0x29c   :  { %v352_v9 = vld [vmem:[#allocation3 + $0x21] sm:$0xf]  ;;  %v338_v12 = vld [vmem:[#allocation3 + $0x8] sm:$0xf] }
 0x29d   :  { %v351_v10 = vld [vmem:[#allocation3 + $0x20] sm:$0xf]  ;;  %358 = vrot.lane.b32.xlu1 %v352_v9, %s1584_s1  ;;  %v337_v20 = vld [vmem:[#allocation3 + $0x7] sm:$0xf] }
 0x29e   :  { %354 = vrot.lane.b32.xlu0 %v351_v10, %s1583_s22  ;;  %v350_v15 = vld [vmem:[#allocation3 + $0x1f] sm:$0xf] }
 0x2a1   :  { %345 = vrot.lane.b32.xlu1 %v339_v11, %s1584_s1 }
 0x2a2   :  { %341 = vrot.lane.b32.xlu0 %v338_v12, %s1583_s22 }
 0x30f   :  { %v359_v13 = vpop.permute.xlu1 %358 }
 0x310   :  { %v355_v14 = vpop.permute.xlu0 %354 }
 0x311   :  { %v361_v16 = vsel %vm42_vm0, %v350_v15, %v355_v14 }
 0x312   :  { %v362_v17 = vsel %vm226_vm10, %v361_v16, %v359_v13 }
 0x313   :  { %v346_v18 = vpop.permute.xlu1 %345  ;;  %v364_v21 = vrot.slane %v362_v17, 4 }
 0x314   :  { %v342_v19 = vpop.permute.xlu0 %341 }
 0x315   :  { %v348_v22 = vsel %vm42_vm0, %v337_v20, %v342_v19  ;;  %v1317_v19 = vld [vmem:[%s2108_s3 + $0x88] sm:$0xff]  ;;  %v1316_v20 = vld [vmem:[%s2108_s3 + $0x80] sm:$0xff] }
 0x316   :  { %v349_v23 = vsel %vm226_vm10, %v348_v22, %v346_v18 }
 0x317   :  { %v366_v24 = vsel %vm115_vm1, %v349_v23, %v364_v21  ;;  %v1310_v21 = vld [vmem:[%s2111_s6 + $0x1] ss:$0 sm:$0xff] }
 0x318   :  { %1431 = vmatmul.mubr.msk.f32.vlgmr.msra.gmra.mxu0 %vm251_vm11, %v366_v24 }
 0x319   :  { %1460 = vmatprep.mubr.msk.f32.mxu0 %vm1582_vm2, %v1581_v4  ;;  %1449 = vmatpush3.msra.mxu0 %v1308_v54 }
 0x31a   :  { %1450 = vmatprep.subr.mxu0 %v1581_v4 }
 0x31b   :  { %1451 = vmatpush3.msra.mxu0 %v1307_v55 }
 0x31c   :  { %1452 = vmatprep.subr.mxu0 %v1581_v4 }
 0x31d   :  { %1453 = vmatpush3.msra.mxu0 %v1306_v59  ;;  %v1321_v59 = vld [vmem:[%s2110_s5 + $0x60] sm:$0xff] }
 0x31e   :  { %1454 = vmatprep.subr.mxu0 %v1581_v4 }
 0x31f   :  { %1455 = vmatpush3.msra.mxu0 %v1305_v62 }
 0x320   :  { %1456 = vmatprep.subr.mxu0 %v1581_v4 }
 0x321   :  { %1457 = vmatpush3.msra.mxu0 %v1304_v0 }
 0x322   :  { %1458 = vmatprep.subr.mxu0 %v1581_v4 }
 0x323   :  { %1459 = vmatpush3.msra.mxu0 %v1303_v1 }
 0x324   :  { %1478 = vmatprep.subr.mxu0 %v1581_v4 }
 0x3d8   :  { %v442_v28 = vpop.f32.mrf.mxu0 }
 0x3d9   :  { %v443_v29 = vadd.f32 %v1292_v27, %v442_v28  ;;  %v1314_v28 = vld [vmem:[%s2108_s3 + $0x70] sm:$0xff] }
 0x3da   :  { %v1432_v30 = vpop.f32.mrf.mxu0 }
 0x3db   :  { %vm446_vm13 = vcmp.ge.f32.partialorder %v443_v29, 0.0  ;;  %v447_v31 = vmul.f32 0.2, %v443_v29  ;;  %v1313_v30 = vld [vmem:[%s2108_s3 + $0x68] sm:$0xff] }
 0x3dd   :  { %v448_v33 = vsel %vm446_vm13, %v443_v29, %v447_v31  ;;  %v1312_v31 = vld [vmem:[%s2108_s3 + $0x60] sm:$0xff] }
 0x3de   :  { %v1835_v35 = vadd.f32 %v448_v33, %v1748_v41 }
 0x3e0   :  { %450 = vst.msk [vmem:[#allocation2 + $0x8] sm:$0xf] %vm203_vm8, %v1835_v35 }
 0x3e1   :  { %451 = vst.msk [vmem:[#allocation2 + $0x1c] sm:$0xf0] %vm205_vm9, %v1835_v35 }
 0x3e7   :  { %v463_v40 = vld [vmem:[#allocation2 + $0x9] sm:$0xf] }
 0x3e8   :  { %v476_v38 = vld [vmem:[#allocation2 + $0x21] sm:$0xf]  ;;  %v462_v41 = vld [vmem:[#allocation2 + $0x8] sm:$0xf] }
 0x3e9   :  { %v475_v39 = vld [vmem:[#allocation2 + $0x20] sm:$0xf]  ;;  %482 = vrot.lane.b32.xlu1 %v476_v38, %s1584_s1  ;;  %v461_v49 = vld [vmem:[#allocation2 + $0x7] sm:$0xf] }
 0x3ea   :  { %478 = vrot.lane.b32.xlu0 %v475_v39, %s1583_s22  ;;  %v474_v44 = vld [vmem:[#allocation2 + $0x1f] sm:$0xf] }
 0x3ed   :  { %469 = vrot.lane.b32.xlu1 %v463_v40, %s1584_s1 }
 0x3ee   :  { %465 = vrot.lane.b32.xlu0 %v462_v41, %s1583_s22 }
 0x45b   :  { %v483_v42 = vpop.permute.xlu1 %482 }
 0x45c   :  { %v479_v43 = vpop.permute.xlu0 %478 }
 0x45d   :  { %v485_v45 = vsel %vm42_vm0, %v474_v44, %v479_v43 }
 0x45e   :  { %v486_v46 = vsel %vm226_vm10, %v485_v45, %v483_v42 }
 0x45f   :  { %v470_v47 = vpop.permute.xlu1 %469  ;;  %v488_v50 = vrot.slane %v486_v46, 4 }
 0x460   :  { %v466_v48 = vpop.permute.xlu0 %465 }
 0x461   :  { %v472_v51 = vsel %vm42_vm0, %v461_v49, %v466_v48  ;;  %v1326_v48 = vld [vmem:[%s2110_s5 + $0x88] sm:$0xff]  ;;  %v1325_v49 = vld [vmem:[%s2110_s5 + $0x80] sm:$0xff] }
 0x462   :  { %v473_v52 = vsel %vm226_vm10, %v472_v51, %v470_v47 }
 0x463   :  { %v490_v53 = vsel %vm115_vm1, %v473_v52, %v488_v50  ;;  %v1319_v50 = vld [vmem:[%s2109_s4 + $0x2] ss:$0 sm:$0xff] }
 0x464   :  { %1446 = vmatmul.mubr.msk.f32.vlgmr.msra.gmra.mxu1 %vm251_vm11, %v490_v53  ;;  %v1324_v53 = vld [vmem:[%s2110_s5 + $0x78] sm:$0xff] }
 0x465   :  { %1475 = vmatprep.mubr.msk.f32.mxu1 %vm1582_vm2, %v1581_v4  ;;  %1464 = vmatpush3.msra.mxu1 %v1317_v19  ;;  %v960_v19 = vld [vmem:[%s2112_s7 + $0x70] sm:$0xff] }
 0x466   :  { %1465 = vmatprep.subr.mxu1 %v1581_v4 }
 0x467   :  { %1466 = vmatpush3.msra.mxu1 %v1316_v20  ;;  %v955_v20 = vld [vmem:[%s2112_s7 + $0x48] sm:$0xff] }
 0x468   :  { %1467 = vmatprep.subr.mxu1 %v1581_v4 }
 0x469   :  { %1468 = vmatpush3.msra.mxu1 %v1315_v26  ;;  %v953_v26 = vld [vmem:[%s2112_s7 + $0x38] sm:$0xff] }
 0x46a   :  { %1469 = vmatprep.subr.mxu1 %v1581_v4 }
 0x46b   :  { %1470 = vmatpush3.msra.mxu1 %v1314_v28  ;;  %v952_v28 = vld [vmem:[%s2112_s7 + $0x30] sm:$0xff] }
 0x46c   :  { %1471 = vmatprep.subr.mxu1 %v1581_v4 }
 0x46d   :  { %1472 = vmatpush3.msra.mxu1 %v1313_v30 }
 0x46e   :  { %1473 = vmatprep.subr.mxu1 %v1581_v4 }
 0x46f   :  { %1474 = vmatpush3.msra.mxu1 %v1312_v31  ;;  %v950_v31 = vld [vmem:[%s2112_s7 + $0x20] sm:$0xff] }
 0x524   :  { %v566_v57 = vpop.f32.mrf.mxu1 }
 0x525   :  { %v567_v58 = vadd.f32 %v1301_v56, %v566_v57  ;;  %v1323_v56 = vld [vmem:[%s2110_s5 + $0x70] sm:$0xff] }
 0x526   :  { %v1447_v60 = vpop.f32.mrf.mxu1 }
 0x527   :  { %vm570_vm14 = vcmp.ge.f32.partialorder %v567_v58, 0.0  ;;  %v571_v61 = vmul.f32 0.2, %v567_v58 }
 0x529   :  { %v572_v63 = vsel %vm570_vm14, %v567_v58, %v571_v61  ;;  %v1322_v58 = vld [vmem:[%s2110_s5 + $0x68] sm:$0xff] }
 0x52a   :  { %573 = vst.msk [vmem:[#allocation3 + $0x8] sm:$0xf] %vm203_vm8, %v572_v63 }
 0x52b   :  { %574 = vst.msk [vmem:[#allocation3 + $0x1c] sm:$0xf0] %vm205_vm9, %v572_v63 }
 0x531   :  { %v586_v5 = vld [vmem:[#allocation3 + $0x9] sm:$0xf] }
 0x532   :  { %v599_v2 = vld [vmem:[#allocation3 + $0x21] sm:$0xf]  ;;  %v585_v6 = vld [vmem:[#allocation3 + $0x8] sm:$0xf] }
 0x533   :  { %v598_v3 = vld [vmem:[#allocation3 + $0x20] sm:$0xf]  ;;  %605 = vrot.lane.b32.xlu1 %v599_v2, %s1584_s1  ;;  %v584_v14 = vld [vmem:[#allocation3 + $0x7] sm:$0xf] }
 0x534   :  { %601 = vrot.lane.b32.xlu0 %v598_v3, %s1583_s22  ;;  %v597_v9 = vld [vmem:[#allocation3 + $0x1f] sm:$0xf] }
 0x537   :  { %592 = vrot.lane.b32.xlu1 %v586_v5, %s1584_s1 }
 0x538   :  { %588 = vrot.lane.b32.xlu0 %v585_v6, %s1583_s22 }
 0x5a5   :  { %v606_v7 = vpop.permute.xlu1 %605 }
 0x5a6   :  { %v602_v8 = vpop.permute.xlu0 %601 }
 0x5a7   :  { %v608_v10 = vsel %vm42_vm0, %v597_v9, %v602_v8 }
 0x5a8   :  { %v609_v11 = vsel %vm226_vm10, %v608_v10, %v606_v7 }
 0x5a9   :  { %v593_v12 = vpop.permute.xlu1 %592  ;;  %v611_v15 = vrot.slane %v609_v11, 4 }
 0x5aa   :  { %v589_v13 = vpop.permute.xlu0 %588 }
 0x5ab   :  { %v595_v16 = vsel %vm42_vm0, %v584_v14, %v589_v13  ;;  %v962_v13 = vld [vmem:[%s2112_s7 + $0x80] sm:$0xff]  ;;  %v961_v14 = vld [vmem:[%s2112_s7 + $0x78] sm:$0xff] }
 0x5ac   :  { %v596_v17 = vsel %vm226_vm10, %v595_v16, %v593_v12  ;;  %1034 = vmatprep.subr.mxu1 %v962_v13  ;;  %v963_v16 = vld [vmem:[%s2112_s7 + $0x88] sm:$0xff] }
 0x5ad   :  { %v613_v18 = vsel %vm115_vm1, %v596_v17, %v611_v15  ;;  %v959_v15 = vld [vmem:[%s2112_s7 + $0x68] sm:$0xff]  ;;  %v958_v17 = vld [vmem:[%s2112_s7 + $0x60] sm:$0xff] }
 0x5ae   :  { %1461 = vmatmul.mubr.msk.f32.vlgmr.msra.gmra.mxu0 %vm251_vm11, %v613_v18  ;;  %v956_v18 = vld [vmem:[%s2112_s7 + $0x50] sm:$0xff] }
 0x5af   :  { %1490 = vmatprep.mubr.msk.f32.mxu0 %vm1582_vm2, %v1581_v4  ;;  %1479 = vmatpush3.msra.mxu0 %v1326_v48 }
 0x5b0   :  { %1480 = vmatprep.subr.mxu0 %v1581_v4 }
 0x5b1   :  { %1481 = vmatpush3.msra.mxu0 %v1325_v49 }
 0x5b2   :  { %1482 = vmatprep.subr.mxu0 %v1581_v4 }
 0x5b3   :  { %1483 = vmatpush3.msra.mxu0 %v1324_v53  ;;  %v1160_v53 = vld [vmem:[%s2114_s9 + $0x28] sm:$0xff] }
 0x5b4   :  { %1484 = vmatprep.subr.mxu0 %v1581_v4 }
 0x5b5   :  { %1485 = vmatpush3.msra.mxu0 %v1323_v56  ;;  %v1158_v56 = vld [vmem:[%s2114_s9 + $0x18] sm:$0xff] }
 0x5b6   :  { %1486 = vmatprep.subr.mxu0 %v1581_v4 }
 0x5b7   :  { %1487 = vmatpush3.msra.mxu0 %v1322_v58  ;;  %v1156_v58 = vld [vmem:[%s2114_s9 + $0x8] sm:$0xff] }
 0x5b8   :  { %1488 = vmatprep.subr.mxu0 %v1581_v4 }
 0x5b9   :  { %1489 = vmatpush3.msra.mxu0 %v1321_v59  ;;  %v1155_v59 = vld [vmem:[%s2114_s9] sm:$0xff] }
 0x5ba   :  { %1493 = vmatprep.subr.mxu0 %v1581_v4 }
 0x66e   :  { %v689_v22 = vpop.f32.mrf.mxu0 }
 0x66f   :  { %v690_v23 = vadd.f32 %v1310_v21, %v689_v22  ;;  %v1328_v21 = vld [vmem:[%s2111_s6 + $0x2] ss:$0 sm:$0xff] }
 0x670   :  { %v1462_v24 = vpop.f32.mrf.mxu0 }
 0x671   :  { %vm693_vm15 = vcmp.ge.f32.partialorder %v690_v23, 0.0  ;;  %v694_v25 = vmul.f32 0.2, %v690_v23 }
 0x673   :  { %v695_v27 = vsel %vm693_vm15, %v690_v23, %v694_v25 }
 0x674   :  { %v1922_v29 = vadd.f32 %v695_v27, %v1835_v35  ;;  %v957_v27 = vld [vmem:[%s2112_s7 + $0x58] sm:$0xff] }
 0x676   :  { %697 = vst.msk [vmem:[#allocation2 + $0x8] sm:$0xf] %vm203_vm8, %v1922_v29 }
 0x677   :  { %698 = vst.msk [vmem:[#allocation2 + $0x1c] sm:$0xf0] %vm205_vm9, %v1922_v29 }
 0x67d   :  { %v710_v34 = vld [vmem:[#allocation2 + $0x9] sm:$0xf] }
 0x67e   :  { %v723_v32 = vld [vmem:[#allocation2 + $0x21] sm:$0xf]  ;;  %v709_v35 = vld [vmem:[#allocation2 + $0x8] sm:$0xf] }
 0x67f   :  { %v722_v33 = vld [vmem:[#allocation2 + $0x20] sm:$0xf]  ;;  %729 = vrot.lane.b32.xlu1 %v723_v32, %s1584_s1  ;;  %v708_v43 = vld [vmem:[#allocation2 + $0x7] sm:$0xf] }
 0x680   :  { %725 = vrot.lane.b32.xlu0 %v722_v33, %s1583_s22  ;;  %v721_v38 = vld [vmem:[#allocation2 + $0x1f] sm:$0xf] }
 0x681   :  { %v954_v32 = vld [vmem:[%s2112_s7 + $0x40] sm:$0xff]  ;;  %v949_v33 = vld [vmem:[%s2112_s7 + $0x18] sm:$0xff] }
 0x683   :  { %716 = vrot.lane.b32.xlu1 %v710_v34, %s1584_s1 }
 0x684   :  { %712 = vrot.lane.b32.xlu0 %v709_v35, %s1583_s22  ;;  %v947_v35 = vld [vmem:[%s2112_s7 + $0x8] sm:$0xff] }
 0x6f1   :  { %v730_v36 = vpop.permute.xlu1 %729 }
 0x6f2   :  { %v726_v37 = vpop.permute.xlu0 %725 }
 0x6f3   :  { %v732_v39 = vsel %vm42_vm0, %v721_v38, %v726_v37  ;;  %v948_v37 = vld [vmem:[%s2112_s7 + $0x10] sm:$0xff] }
 0x6f4   :  { %v733_v40 = vsel %vm226_vm10, %v732_v39, %v730_v36  ;;  %v951_v36 = vld [vmem:[%s2112_s7 + $0x28] sm:$0xff] }
 0x6f5   :  { %v717_v41 = vpop.permute.xlu1 %716  ;;  %v735_v44 = vrot.slane %v733_v40, 4 }
 0x6f6   :  { %v713_v42 = vpop.permute.xlu0 %712 }
 0x6f7   :  { %v719_v45 = vsel %vm42_vm0, %v708_v43, %v713_v42 }
 0x6f8   :  { %v720_v46 = vsel %vm226_vm10, %v719_v45, %v717_v41 }
 0x6f9   :  { %v737_v47 = vsel %vm115_vm1, %v720_v46, %v735_v44 }
 0x6fa   :  { %1476 = vmatmul.mubr.msk.f32.vlgmr.msra.gmra.mxu1 %vm251_vm11, %v737_v47 }
 0x6fb   :  { %1078 = vmatprep.mubr.f32.mxu1 %v1581_v4  ;;  %1035 = vmatpush1.msra.mxu1 %v961_v14 }
 0x6fc   :  { %1036 = vmatprep.subr.mxu1 %v959_v15 }
 0x6fd   :  { %1037 = vmatpush1.msra.mxu1 %v958_v17 }
 0x6fe   :  { %1038 = vmatprep.subr.mxu1 %v956_v18 }
 0x6ff   :  { %1039 = vmatpush1.msra.mxu1 %v955_v20 }
 0x700   :  { %1040 = vmatprep.subr.mxu1 %v953_v26 }
 0x701   :  { %1041 = vmatpush1.msra.mxu1 %v952_v28 }
 0x702   :  { %1042 = vmatprep.subr.mxu1 %v950_v31 }
 0x703   :  { %1043 = vmatpush1.msra.mxu1 %v949_v33 }
 0x704   :  { %1044 = vmatprep.subr.mxu1 %v947_v35 }
 0x7ba   :  { %v813_v51 = vpop.f32.mrf.mxu1 }
 0x7bb   :  { %v814_v52 = vadd.f32 %v1319_v50, %v813_v51 }
 0x7bc   :  { %v1477_v54 = vpop.f32.mrf.mxu1 }
 0x7bd   :  { %vm817_vm3 = vcmp.ge.f32.partialorder %v814_v52, 0.0  ;;  %v818_v55 = vmul.f32 0.2, %v814_v52 }
 0x7bf   :  { %v819_v57 = vsel %vm817_vm3, %v814_v52, %v818_v55  ;;  %v1159_v55 = vld [vmem:[%s2114_s9 + $0x20] sm:$0xff] }
 0x7c0   :  { %820 = vst.msk [vmem:[#allocation3 + $0x8] sm:$0xf] %vm203_vm8, %v819_v57 }
 0x7c1   :  { %821 = vst.msk [vmem:[#allocation3 + $0x1c] sm:$0xf0] %vm205_vm9, %v819_v57  ;;  %v1157_v57 = vld [vmem:[%s2114_s9 + $0x10] sm:$0xff]  ;;  %s1585_s9 = smov [#allocation4]  }
 0x7c2   :  { %s1260_s17 = sshll.u32 %s1585_s9, 4  ;;  %s1261_s17 = int_to_ptr.vmem [resolvable:$true] %s1260_s17 }
 0x7c3   :  { %p1539_p1 = scmp.lt.s32.totalorder %s1261_s17, %s1261_s17 }
 0x7c7   :  { %v833_v62 = vld [vmem:[#allocation3 + $0x9] sm:$0xf] }
 0x7c8   :  { %v846_v60 = vld [vmem:[#allocation3 + $0x21] sm:$0xf]  ;;  %v832_v63 = vld [vmem:[#allocation3 + $0x8] sm:$0xf] }
 0x7c9   :  { %v845_v61 = vld [vmem:[#allocation3 + $0x20] sm:$0xf]  ;;  %852 = vrot.lane.b32.xlu1 %v846_v60, %s1584_s1  ;;  %v831_v8 = vld [vmem:[#allocation3 + $0x7] sm:$0xf]  ;;  %v996_v60 = vlaneseq }
 0x7ca   :  { %848 = vrot.lane.b32.xlu0 %v845_v61, %s1583_s22  ;;  %v844_v2 = vld [vmem:[#allocation3 + $0x1f] sm:$0xf] }
 0x7cb   :  { %v997_v61 = vshrl.u32 %v996_v60, 7 }
 0x7cd   :  { %839 = vrot.lane.b32.xlu1 %v833_v62, %s1584_s1  ;;  %v1006_v62 = vsub.s32 2, %v997_v61 }
 0x7ce   :  { %835 = vrot.lane.b32.xlu0 %v832_v63, %s1583_s22  ;;  %v964_v63 = vld [vmem:[%s2113_s8] sm:$0x7]  ;;  %s1534_s8 = scalar_lea.vmem %s1261_s17, 384 }
 0x7cf   :  { %p1535_p0 = scmp.ne.s32.totalorder %s1261_s17, %s1534_s8  ;;  %p1540_p2 = scmp.lt.s32.totalorder %s1534_s8, %s1534_s8 }
 0x7d1   :  { %p1541_p3 = por %p1540_p2, %p1539_p1 }
 0x7d3   :  { %p1542_p4 = pnand %p1541_p3, %p1535_p0 }
 0x83b   :  { %v853_v0 = vpop.permute.xlu1 %852 }
 0x83c   :  { %v849_v1 = vpop.permute.xlu0 %848 }
 0x83d   :  { %v855_v3 = vsel %vm42_vm0, %v844_v2, %v849_v1  ;;  %v1002_v1 = vsub.s32 1, %v997_v61  ;;  %v1007_v2 = vrot.slane %v964_v63, %v1006_v62 }
 0x83e   :  { %v856_v5 = vsel %vm226_vm10, %v855_v3, %v853_v0  ;;  %v998_v0 = vsub.s32 0, %v997_v61 }
 0x83f   :  { %v840_v6 = vpop.permute.xlu1 %839  ;;  %v858_v9 = vrot.slane %v856_v5, 4  ;;  %v1003_v5 = vrot.slane %v964_v63, %v1002_v1 }
 0x840   :  { %v836_v7 = vpop.permute.xlu0 %835  ;;  %v999_v3 = vrot.slane %v964_v63, %v998_v0 }
 0x841   :  { %v842_v10 = vsel %vm42_vm0, %v831_v8, %v836_v7 }
 0x842   :  { %v843_v11 = vsel %vm226_vm10, %v842_v10, %v840_v6 }
 0x843   :  { %v860_v12 = vsel %vm115_vm1, %v843_v11, %v858_v9 }
 0x844   :  { %1491 = vmatmul.mubr.msk.f32.vlgmr.msra.gmra.mxu0 %vm251_vm11, %v860_v12 }
 0x845   :  { %1505 = vmatprep.mubr.msk.f32.mxu0 %vm1582_vm2, %v1581_v4  ;;  %1494 = vmatpush3.msra.mxu0 %v963_v16 }
 0x846   :  { %1495 = vmatprep.subr.mxu0 %v1581_v4 }
 0x847   :  { %1496 = vmatpush3.msra.mxu0 %v960_v19 }
 0x848   :  { %1497 = vmatprep.subr.mxu0 %v1581_v4 }
 0x849   :  { %1498 = vmatpush3.msra.mxu0 %v957_v27 }
 0x84a   :  { %1499 = vmatprep.subr.mxu0 %v1581_v4 }
 0x84b   :  { %1500 = vmatpush3.msra.mxu0 %v954_v32 }
 0x84c   :  { %1501 = vmatprep.subr.mxu0 %v1581_v4 }
 0x84d   :  { %1502 = vmatpush3.msra.mxu0 %v951_v36 }
 0x84e   :  { %1503 = vmatprep.subr.mxu0 %v1581_v4 }
 0x84f   :  { %1504 = vmatpush3.msra.mxu0 %v948_v37 }
 0x904   :  { %v936_v22 = vpop.f32.mrf.mxu0 }
 0x905   :  { %v937_v23 = vadd.f32 %v1328_v21, %v936_v22 }
 0x906   :  { %v1492_v24 = vpop.f32.mrf.mxu0 }
 0x907   :  { %vm940_vm4 = vcmp.ge.f32.partialorder %v937_v23, 0.0  ;;  %v941_v25 = vmul.f32 0.2, %v937_v23 }
 0x909   :  { %v942_v30 = vsel %vm940_vm4, %v937_v23, %v941_v25 }
 0x90a   :  { %v943_v34 = vadd.f32 %v942_v30, %v1922_v29  ;;  %v946_v29 = vld [vmem:[%s2112_s7] sm:$0xff] }
 0x90b   :  { %1045 = vmatpush1.msra.mxu1 %v946_v29 }
 0x90c   :  { %944 = vst.msk [vmem:[#allocation2 + $0x8] sm:$0xf] %vm203_vm8, %v943_v34  ;;  %1508 = vmatprep.subr.mxu1 %v1581_v4 }
 0x90d   :  { %945 = vst.msk [vmem:[#allocation2 + $0x1c] sm:$0xf0] %vm205_vm9, %v943_v34 }
 0x913   :  { %v967_v40 = vld [vmem:[#allocation2 + $0x9] sm:$0xf] }
 0x914   :  { %v980_v38 = vld [vmem:[#allocation2 + $0x21] sm:$0xf]  ;;  %v966_v41 = vld [vmem:[#allocation2 + $0x8] sm:$0xf] }
 0x915   :  { %v979_v39 = vld [vmem:[#allocation2 + $0x20] sm:$0xf]  ;;  %986 = vrot.lane.b32.xlu1 %v980_v38, %s1584_s1  ;;  %v965_v49 = vld [vmem:[#allocation2 + $0x7] sm:$0xf] }
 0x916   :  { %982 = vrot.lane.b32.xlu0 %v979_v39, %s1583_s22  ;;  %v978_v44 = vld [vmem:[#allocation2 + $0x1f] sm:$0xf] }
 0x919   :  { %973 = vrot.lane.b32.xlu1 %v967_v40, %s1584_s1 }
 0x91a   :  { %969 = vrot.lane.b32.xlu0 %v966_v41, %s1583_s22 }
 0x987   :  { %v987_v42 = vpop.permute.xlu1 %986 }
 0x988   :  { %v983_v43 = vpop.permute.xlu0 %982 }
 0x989   :  { %v989_v45 = vsel %vm42_vm0, %v978_v44, %v983_v43 }
 0x98a   :  { %v990_v46 = vsel %vm226_vm10, %v989_v45, %v987_v42 }
 0x98b   :  { %v974_v47 = vpop.permute.xlu1 %973  ;;  %v992_v50 = vrot.slane %v990_v46, 4 }
 0x98c   :  { %v970_v48 = vpop.permute.xlu0 %969 }
 0x98d   :  { %v976_v51 = vsel %vm42_vm0, %v965_v49, %v970_v48 }
 0x98e   :  { %v977_v52 = vsel %vm226_vm10, %v976_v51, %v974_v47 }
 0x98f   :  { %v994_v54 = vsel %vm115_vm1, %v977_v52, %v992_v50 }
 0x990   :  { %1330 = vmatmul.mubr.msk.f32.vlgmr.msra.gmra.mxu1 %vm251_vm11, %v994_v54  ;;  %1506 = vmatmul.mubr.msk.f32.vlgmr.msra.gmra.mxu0 %vm251_vm11, %v994_v54 }
 0x991   :  { %1509 = vmatpush3.msra.mxu1 %v1160_v53  ;;  %1520 = vmatprep.mubr.msk.f32.mxu1 %vm1582_vm2, %v1581_v4 }
 0x992   :  { %1510 = vmatprep.subr.mxu1 %v1581_v4 }
 0x993   :  { %1511 = vmatpush3.msra.mxu1 %v1159_v55 }
 0x994   :  { %1512 = vmatprep.subr.mxu1 %v1581_v4 }
 0x995   :  { %1513 = vmatpush3.msra.mxu1 %v1158_v56 }
 0x996   :  { %1514 = vmatprep.subr.mxu1 %v1581_v4 }
 0x997   :  { %1515 = vmatpush3.msra.mxu1 %v1157_v57 }
 0x998   :  { %1516 = vmatprep.subr.mxu1 %v1581_v4 }
 0x999   :  { %1517 = vmatpush3.msra.mxu1 %v1156_v58 }
 0x99a   :  { %1518 = vmatprep.subr.mxu1 %v1581_v4 }
 0x99b   :  { %1519 = vmatpush3.msra.mxu1 %v1155_v59 }
 0x99c   :  { %1521 = vmatmul.mubr.msk.f32.vlgmr.msra.gmra.mxu1 %vm251_vm11, %v994_v54 }
 0xa50   :  { %v1080_v6 = vpop.f32.mrf.mxu1  ;;  %v1151_v7 = vpop.f32.mrf.mxu0 }
 0xa51   :  { %v1152_v8 = vadd.f32 %v1151_v7, %v1007_v2  ;;  %v1081_v10 = vadd.f32 %v1080_v6, %v999_v3 }
 0xa52   :  { %v1082_v9 = vpop.f32.mrf.mxu1  ;;  %v1507_v4 = vpop.f32.mrf.mxu0 }
 0xa53   :  { %1244 = vst [vmem:[#allocation4 + $0x8] sm:$0xf] %v1152_v8  ;;  %v1247_v11 = vcombine.high %v1152_v8, %v1152_v8  ;;  %v1083_v12 = vadd.f32 %v1082_v9, %v1003_v5 }
 0xa55   :  { %1252 = vst [vmem:[#allocation4 + $0x14] sm:$0xf] %v1247_v11  ;;  %v1241_v13 = vcombine.low %v1081_v10, %v1083_v12  ;;  %v1246_v14 = vcombine.high %v1081_v10, %v1083_v12 }
 0xa57   :  { %1243 = vst [vmem:[#allocation4] sm:$0xff] %v1241_v13  ;;  %1251 = vst [vmem:[#allocation4 + $0xc] sm:$0xff] %v1246_v14 }
 0xa58   :  { %1545 = shalt.err (!%p1542_p4)
}
 0xa59   :  { %s1586_s18 = smov 192   ;;  %v1332_v15 = vld [vmem:[%s2115_s10] ss:$0 sm:$0xff]  ;;  %s1587_s24 = smov [#allocation6]  }
 0xa5a   :  { %1266 = dma.vmem_to_hbm [thread:$0]  %s1261_s17, 384, %s2116_s11, [#allocation5], %s1586_s18, %s1586_s18, %s1580_s13  }
 0xa5b   :  { %s1272_s26 = sshll.u32 %s1587_s24, 4  ;;  %s1273_s26 = int_to_ptr.vmem [resolvable:$true] %s1272_s26 }
 0xa5c   :  { %v1234_v16 = vpop.f32.mrf.mxu1  ;;  %s1554_s2 = scalar_lea.vmem %s1273_s26, 128  ;;  %p1559_p6 = scmp.lt.s32.totalorder %s1273_s26, %s1273_s26 }
 0xa5d   :  { %v1235_v17 = vadd.f32 %v1332_v15, %v1234_v16  ;;  %p1555_p5 = scmp.ne.s32.totalorder %s1273_s26, %s1554_s2  ;;  %p1560_p7 = scmp.lt.s32.totalorder %s1554_s2, %s1554_s2 }
 0xa5e   :  { %v1522_v18 = vpop.f32.mrf.mxu1 }
 0xa5f   :  { %1245 = vst [vmem:[#allocation6] sm:$0xff] %v1235_v17   ;;  %p1561_p8 = por %p1560_p7, %p1559_p6 }
 0xa61   :  { %p1562_p9 = pnand %p1561_p8, %p1555_p5 }
 0xa63   :  { %1565 = shalt.err (!%p1562_p9)
}
 0xa64   :  { %s1588_s4 = smov 64  }
 0xa65   :  { %1278 = dma.vmem_to_hbm [thread:$0]  %s1273_s26, 128, %s2117_s12, [#allocation7], %s1588_s4, %s1588_s4, %s1578_s25  }
 0xa66   :  { %1574 = dma.done.wait [#allocation5], 384  }
 0xa67   :  { %1575 = vsyncadd [#allocation5], 4294966912 }
 0xa68   :  { %1576 = dma.done.wait [#allocation7], 128  }
 0xa69   :  { %1577 = vsyncadd [#allocation7], 4294967168 }
 0xa6a   :  { %1285 = vsyncpa [#allocation5], 1 }
 0xa6b   :  { %1286 = vsyncpa [#allocation7], 1 }

</bundles_post_ra>
